<compile_context>
chip_gen: v5e
topology: v5e:2x2
jax: 0.10.0
libtpu: 0.0.40
codegen_flags: <defaults>
</compile_context>

<pallas_src>
import functools
import math

import jax
import jax.numpy as jnp
from jax.experimental import pallas as pl
from jax.experimental.pallas import tpu as pltpu

LN_EPS = 1e-5
_GELU_C = math.sqrt(2.0 / math.pi)


def _layernorm(x, gamma, beta):
    # x: (N, D); gamma/beta: (1, D). Biased variance, like torch.nn.LayerNorm.
    mean = jnp.mean(x, axis=-1, keepdims=True)
    var = jnp.mean((x - mean) ** 2, axis=-1, keepdims=True)
    return (x - mean) * jax.lax.rsqrt(var + LN_EPS) * gamma + beta


def _gelu_tanh(x):
    # Exact formula of the module's custom GELU class (tanh form).
    return 0.5 * x * (1.0 + jnp.tanh(_GELU_C * (x + 0.044715 * (x * x * x))))


# ---------------------------------------------------------------------------
# Fused per-layer kernel (one grid step = one batch element):
#   x = x + to_out( attn( LN1(x) ) )
#   x = x + W2 @ GELU( W1 @ LN2(x) + b1 ) + b2
# ---------------------------------------------------------------------------
def _layer_kernel(x_ref, vec_ref, b1_ref, wqkv_ref, wout_ref, w1_ref, w2_ref,
                  o_ref, *, heads, dim_head):
    x = x_ref[0]                                    # (N, D) float32
    n_tok = x.shape[0]
    d_model = x.shape[1]

    vecs = vec_ref[...]                             # (6, D) f32
    ln1_g, ln1_b = vecs[0:1], vecs[1:2]
    b_out = vecs[2:3]
    ln2_g, ln2_b = vecs[3:4], vecs[4:5]
    b2 = vecs[5:6]

    # ---------------- Attention block ----------------
    xn = _layernorm(x, ln1_g, ln1_b)                               # (N, D) f32
    xn_b = jnp.broadcast_to(xn.astype(jnp.bfloat16)[None],
                            (3 * heads, n_tok, d_model))           # (3h, N, D)

    # Head-batched QKV projection; 1/sqrt(dh) is already folded into W_q.
    qkv = jnp.einsum('hnd,hde->hne', xn_b, wqkv_ref[...],
                     preferred_element_type=jnp.float32)           # (3h, N, dh)
    q = qkv[0 * heads:1 * heads].astype(jnp.bfloat16)              # (h, N, dh)
    k = qkv[1 * heads:2 * heads].astype(jnp.bfloat16)
    v = qkv[2 * heads:3 * heads].astype(jnp.bfloat16)

    dots = jnp.einsum('hqd,hkd->hqk', q, k,
                      preferred_element_type=jnp.float32)          # (h, N, N)
    dots = dots - jnp.max(dots, axis=-1, keepdims=True)
    p = jnp.exp(dots)
    denom = jnp.sum(p, axis=-1, keepdims=True)                     # (h, N, 1)

    pv = jnp.einsum('hqk,hkd->hqd', p.astype(jnp.bfloat16), v,
                    preferred_element_type=jnp.float32)            # (h, N, dh)
    # Deferred softmax normalisation on the small (h, N, dh) tensor.
    head_out = pv * pl.reciprocal(denom, approx=True)

    # Head-batched output projection + reduce over heads
    # ( == concat over heads followed by (N, inner) @ (inner, D) ).
    proj = jnp.einsum('hnd,hde->hne', head_out.astype(jnp.bfloat16),
                      wout_ref[...],
                      preferred_element_type=jnp.float32)          # (h, N, D)
    attn_out = jnp.sum(proj, axis=0) + b_out                       # (N, D)
    x = x + attn_out                                               # residual

    # ---------------- Feed-forward block ----------------
    xn2 = _layernorm(x, ln2_g, ln2_b)
    h1 = jnp.dot(xn2.astype(jnp.bfloat16), w1_ref[...],
                 preferred_element_type=jnp.float32) + b1_ref[...]  # (N, H)
    h1 = _gelu_tanh(h1)
    ff = jnp.dot(h1.astype(jnp.bfloat16), w2_ref[...],
                 preferred_element_type=jnp.float32) + b2           # (N, D)

    o_ref[0] = (x + ff).astype(o_ref.dtype)                         # residual


# ---------------------------------------------------------------------------
# Wrapper: one fused pallas_call per transformer layer
# ---------------------------------------------------------------------------
def transformer_layer(x, p, *, heads, dim_head):
    B, N, D = x.shape
    kernel = functools.partial(_layer_kernel, heads=heads, dim_head=dim_head)

    def full(a):
        return pl.BlockSpec(a.shape, lambda b, _nd=a.ndim: (0,) * _nd)

    return pl.pallas_call(
        kernel,
        out_shape=jax.ShapeDtypeStruct((B, N, D), x.dtype),
        grid=(B,),
        in_specs=[
            pl.BlockSpec((1, N, D), lambda b: (b, 0, 0)),   # x
            full(p["vecs"]),                                # ln1 g/b, b_out, ln2 g/b, b2
            full(p["b1"]),                                  # FFN bias 1
            full(p["w_qkv"]),                               # (3*heads, D, dh) bf16
            full(p["w_out"]),                               # (heads, dh, D)   bf16
            full(p["w1"]),                                  # (D, H) bf16
            full(p["w2"]),                                  # (H, D) bf16
        ],
        out_specs=pl.BlockSpec((1, N, D), lambda b: (b, 0, 0)),
        compiler_params=pltpu.CompilerParams(
            dimension_semantics=("parallel",),
            vmem_limit_bytes=48 * 1024 * 1024),
    )(x, p["vecs"], p["b1"], p["w_qkv"], p["w_out"], p["w1"], p["w2"])


# ---------------------------------------------------------------------------
# Parameter init (deterministic): generate PyTorch-layout-equivalent f32
# weights, then pack into the kernel's head-batched layout.
# ---------------------------------------------------------------------------
def init_transformer_params(key, dim, depth, heads, dim_head, mlp_dim):
    inner = heads * dim_head
    scale = dim_head ** (-0.5)
    layers = []
    for _ in range(depth):
        key, k1, k2, k3, k4 = jax.random.split(key, 5)
        # y = x @ w convention (nn.Linear weight transposed)
        w_qkv = jax.random.normal(k1, (dim, 3 * inner), jnp.float32) / math.sqrt(dim)
        w_out = jax.random.normal(k2, (inner, dim), jnp.float32) / math.sqrt(inner)
        w1 = jax.random.normal(k3, (dim, mlp_dim), jnp.float32) / math.sqrt(dim)
        w2 = jax.random.normal(k4, (mlp_dim, dim), jnp.float32) / math.sqrt(mlp_dim)
        ln1_g = jnp.ones((dim,), jnp.float32)
        ln1_b = jnp.zeros((dim,), jnp.float32)
        ln2_g = jnp.ones((dim,), jnp.float32)
        ln2_b = jnp.zeros((dim,), jnp.float32)
        b_out = jnp.zeros((dim,), jnp.float32)
        b1 = jnp.zeros((mlp_dim,), jnp.float32)
        b2 = jnp.zeros((dim,), jnp.float32)

        # Pack QKV into (3*heads, D, dh): column c = j*inner + h*dh + d of the
        # PyTorch layout ('b n (h d)' with h major).  Fold softmax scale into W_q.
        w_qkv_h = (w_qkv.reshape(dim, 3, heads, dim_head)
                        .transpose(1, 2, 0, 3)
                        .reshape(3 * heads, dim, dim_head))
        w_qkv_h = w_qkv_h.at[:heads].multiply(scale)
        # Output projection packed per head: (heads, dh, D).
        w_out_h = w_out.reshape(heads, dim_head, dim)

        layers.append({
            "vecs": jnp.stack([ln1_g, ln1_b, b_out, ln2_g, ln2_b, b2], axis=0),  # (6, D) f32
            "b1": b1.reshape(1, mlp_dim),                                         # (1, H) f32
            "w_qkv": w_qkv_h.astype(jnp.bfloat16),
            "w_out": w_out_h.astype(jnp.bfloat16),
            "w1": w1.astype(jnp.bfloat16),
            "w2": w2.astype(jnp.bfloat16),
        })
    return layers


@functools.partial(jax.jit, static_argnames=("heads", "dim_head"))
def transformer_forward(x, layers, *, heads, dim_head):
    for p in layers:
        x = transformer_layer(x, p, heads=heads, dim_head=dim_head)
    return x


if __name__ == "__main__":
    # Small shapes consistent with the module: x is (batch, seq, dim).
    # dim_head uses the PyTorch default (64) so the attention contraction is
    # not pathologically narrow on the MXU.
    B, N, DIM = 2, 8, 32
    DEPTH, HEADS, DIM_HEAD, MLP_DIM = 2, 4, 64, 64

    key = jax.random.PRNGKey(0)
    kx, kp = jax.random.split(key)
    x = jax.random.normal(kx, (B, N, DIM), jnp.float32)
    params = init_transformer_params(kp, DIM, DEPTH, HEADS, DIM_HEAD, MLP_DIM)

    out = transformer_forward(x, params, heads=HEADS, dim_head=DIM_HEAD)
    out = jax.block_until_ready(out)
    assert out.shape == (B, N, DIM) and out.dtype == jnp.float32
    assert bool(jnp.all(jnp.isfinite(out)))
    print("KERNEL_OK")
</pallas_src>

<mosaic_0001>
module attributes {stable_mosaic.version = 11 : i64} {
  func.func @_layer_kernel(%arg0: i32, %arg1: memref<1x8x32xf32, #tpu.memory_space<vmem>>, %arg2: memref<6x32xf32, #tpu.memory_space<vmem>>, %arg3: memref<1x64xf32, #tpu.memory_space<vmem>>, %arg4: memref<12x32x64xbf16, #tpu.memory_space<vmem>>, %arg5: memref<4x64x32xbf16, #tpu.memory_space<vmem>>, %arg6: memref<32x64xbf16, #tpu.memory_space<vmem>>, %arg7: memref<64x32xbf16, #tpu.memory_space<vmem>>, %arg8: memref<1x8x32xf32, #tpu.memory_space<vmem>>) attributes {dimension_semantics = [#tpu.dimension_semantics<parallel>], iteration_bounds = array<i64: 2>, scalar_prefetch = 0 : i64, scratch_operands = 0 : i64, tpu.core_type = #tpu.core_type<tc>, window_params = [{transform_indices = @transform_0, window_bounds = array<i64: 1, 8, 32>}, {pipeline_mode = #tpu.pipeline_mode<synchronous>, transform_indices = @transform_1, window_bounds = array<i64: 6, 32>}, {pipeline_mode = #tpu.pipeline_mode<synchronous>, transform_indices = @transform_2, window_bounds = array<i64: 1, 64>}, {pipeline_mode = #tpu.pipeline_mode<synchronous>, transform_indices = @transform_3, window_bounds = array<i64: 12, 32, 64>}, {pipeline_mode = #tpu.pipeline_mode<synchronous>, transform_indices = @transform_4, window_bounds = array<i64: 4, 64, 32>}, {pipeline_mode = #tpu.pipeline_mode<synchronous>, transform_indices = @transform_5, window_bounds = array<i64: 32, 64>}, {pipeline_mode = #tpu.pipeline_mode<synchronous>, transform_indices = @transform_6, window_bounds = array<i64: 64, 32>}, {transform_indices = @transform_7, window_bounds = array<i64: 1, 8, 32>}]} {
    %c0 = arith.constant 0 : index
    %c0_0 = arith.constant 0 : index
    %c0_1 = arith.constant 0 : index
    %0 = vector.load %arg1[%c0, %c0_0, %c0_1] : memref<1x8x32xf32, #tpu.memory_space<vmem>>, vector<1x8x32xf32>
    %1 = vector.shape_cast %0 : vector<1x8x32xf32> to vector<8x32xf32>
    %c0_2 = arith.constant 0 : index
    %c0_3 = arith.constant 0 : index
    %2 = vector.load %arg2[%c0_2, %c0_3] : memref<6x32xf32, #tpu.memory_space<vmem>>, vector<6x32xf32>
    %3 = vector.extract_strided_slice %2 {offsets = [0, 0], sizes = [1, 32], strides = [1, 1]} : vector<6x32xf32> to vector<1x32xf32>
    %4 = vector.extract_strided_slice %2 {offsets = [1, 0], sizes = [1, 32], strides = [1, 1]} : vector<6x32xf32> to vector<1x32xf32>
    %5 = vector.extract_strided_slice %2 {offsets = [2, 0], sizes = [1, 32], strides = [1, 1]} : vector<6x32xf32> to vector<1x32xf32>
    %6 = vector.extract_strided_slice %2 {offsets = [3, 0], sizes = [1, 32], strides = [1, 1]} : vector<6x32xf32> to vector<1x32xf32>
    %7 = vector.extract_strided_slice %2 {offsets = [4, 0], sizes = [1, 32], strides = [1, 1]} : vector<6x32xf32> to vector<1x32xf32>
    %8 = vector.extract_strided_slice %2 {offsets = [5, 0], sizes = [1, 32], strides = [1, 1]} : vector<6x32xf32> to vector<1x32xf32>
    %cst = arith.constant dense<0.000000e+00> : vector<8xf32>
    %9 = vector.multi_reduction <add>, %1, %cst [1] : vector<8x32xf32> to vector<8xf32>
    %10 = vector.shape_cast %9 : vector<8xf32> to vector<8x1xf32>
    %cst_4 = arith.constant 3.200000e+01 : f32
    %11 = vector.broadcast %cst_4 : f32 to vector<8x1xf32>
    %12 = arith.divf %10, %11 : vector<8x1xf32>
    %13 = vector.broadcast %12 : vector<8x1xf32> to vector<8x32xf32>
    %14 = arith.subf %1, %13 : vector<8x32xf32>
    %15 = arith.mulf %14, %14 : vector<8x32xf32>
    %cst_5 = arith.constant dense<0.000000e+00> : vector<8xf32>
    %16 = vector.multi_reduction <add>, %15, %cst_5 [1] : vector<8x32xf32> to vector<8xf32>
    %17 = vector.shape_cast %16 : vector<8xf32> to vector<8x1xf32>
    %cst_6 = arith.constant 3.200000e+01 : f32
    %18 = vector.broadcast %cst_6 : f32 to vector<8x1xf32>
    %19 = arith.divf %17, %18 : vector<8x1xf32>
    %20 = vector.broadcast %12 : vector<8x1xf32> to vector<8x32xf32>
    %21 = arith.subf %1, %20 : vector<8x32xf32>
    %cst_7 = arith.constant 9.99999974E-6 : f32
    %22 = vector.broadcast %cst_7 : f32 to vector<8x1xf32>
    %23 = arith.addf %19, %22 : vector<8x1xf32>
    %24 = math.rsqrt %23 : vector<8x1xf32>
    %25 = vector.broadcast %24 : vector<8x1xf32> to vector<8x32xf32>
    %26 = arith.mulf %21, %25 : vector<8x32xf32>
    %27 = vector.broadcast %3 : vector<1x32xf32> to vector<8x32xf32>
    %28 = arith.mulf %26, %27 : vector<8x32xf32>
    %29 = vector.broadcast %4 : vector<1x32xf32> to vector<8x32xf32>
    %30 = arith.addf %28, %29 : vector<8x32xf32>
    %31 = arith.truncf %30 : vector<8x32xf32> to vector<8x32xbf16>
    %32 = vector.shape_cast %31 : vector<8x32xbf16> to vector<1x8x32xbf16>
    %33 = vector.shape_cast %32 : vector<1x8x32xbf16> to vector<1x8x32xbf16>
    %34 = vector.broadcast %33 : vector<1x8x32xbf16> to vector<12x8x32xbf16>
    %c0_8 = arith.constant 0 : index
    %c0_9 = arith.constant 0 : index
    %c0_10 = arith.constant 0 : index
    %35 = vector.load %arg4[%c0_8, %c0_9, %c0_10] : memref<12x32x64xbf16, #tpu.memory_space<vmem>>, vector<12x32x64xbf16>
    "tpu.trace_start"() <{level = 10 : i32, message = "hnd,hde->hne"}> : () -> ()
    %cst_11 = arith.constant dense<0.000000e+00> : vector<12x8x64xf32>
    %36 = tpu.matmul %34, %35, %cst_11 {dimension_numbers = #tpu.dot_dimension_numbers<[2], [1], [1], [2], [0, 0, 0, 1, 1, 2], [0], [0]>} : vector<12x8x32xbf16>, vector<12x32x64xbf16>, vector<12x8x64xf32> -> vector<12x8x64xf32>
    "tpu.trace_stop"() : () -> ()
    %37 = vector.extract_strided_slice %36 {offsets = [0, 0, 0], sizes = [4, 8, 64], strides = [1, 1, 1]} : vector<12x8x64xf32> to vector<4x8x64xf32>
    %38 = arith.truncf %37 : vector<4x8x64xf32> to vector<4x8x64xbf16>
    %39 = vector.extract_strided_slice %36 {offsets = [4, 0, 0], sizes = [4, 8, 64], strides = [1, 1, 1]} : vector<12x8x64xf32> to vector<4x8x64xf32>
    %40 = arith.truncf %39 : vector<4x8x64xf32> to vector<4x8x64xbf16>
    %41 = vector.extract_strided_slice %36 {offsets = [8, 0, 0], sizes = [4, 8, 64], strides = [1, 1, 1]} : vector<12x8x64xf32> to vector<4x8x64xf32>
    %42 = arith.truncf %41 : vector<4x8x64xf32> to vector<4x8x64xbf16>
    "tpu.trace_start"() <{level = 10 : i32, message = "hqd,hkd->hqk"}> : () -> ()
    %cst_12 = arith.constant dense<0.000000e+00> : vector<4x8x8xf32>
    %43 = tpu.matmul %38, %40, %cst_12 {dimension_numbers = #tpu.dot_dimension_numbers<[2], [2], [1], [1], [0, 0, 0, 1, 1, 1], [0], [0]>} : vector<4x8x64xbf16>, vector<4x8x64xbf16>, vector<4x8x8xf32> -> vector<4x8x8xf32>
    "tpu.trace_stop"() : () -> ()
    %cst_13 = arith.constant dense<0xFF800000> : vector<4x8xf32>
    %44 = vector.multi_reduction <maximumf>, %43, %cst_13 [2] : vector<4x8x8xf32> to vector<4x8xf32>
    %45 = vector.shape_cast %44 : vector<4x8xf32> to vector<4x8x1xf32>
    %46 = vector.broadcast %45 : vector<4x8x1xf32> to vector<4x8x8xf32>
    %47 = arith.subf %43, %46 : vector<4x8x8xf32>
    %48 = math.exp %47 : vector<4x8x8xf32>
    %cst_14 = arith.constant dense<0.000000e+00> : vector<4x8xf32>
    %49 = vector.multi_reduction <add>, %48, %cst_14 [2] : vector<4x8x8xf32> to vector<4x8xf32>
    %50 = vector.shape_cast %49 : vector<4x8xf32> to vector<4x8x1xf32>
    %51 = arith.truncf %48 : vector<4x8x8xf32> to vector<4x8x8xbf16>
    "tpu.trace_start"() <{level = 10 : i32, message = "hqk,hkd->hqd"}> : () -> ()
    %cst_15 = arith.constant dense<0.000000e+00> : vector<4x8x64xf32>
    %52 = tpu.matmul %51, %42, %cst_15 {dimension_numbers = #tpu.dot_dimension_numbers<[2], [1], [1], [2], [0, 0, 0, 1, 1, 2], [0], [0]>} : vector<4x8x8xbf16>, vector<4x8x64xbf16>, vector<4x8x64xf32> -> vector<4x8x64xf32>
    "tpu.trace_stop"() : () -> ()
    %53 = tpu.reciprocal %50 {approx = true} : vector<4x8x1xf32> -> vector<4x8x1xf32>
    %54 = vector.broadcast %53 : vector<4x8x1xf32> to vector<4x8x64xf32>
    %55 = arith.mulf %52, %54 : vector<4x8x64xf32>
    %56 = arith.truncf %55 : vector<4x8x64xf32> to vector<4x8x64xbf16>
    %c0_16 = arith.constant 0 : index
    %c0_17 = arith.constant 0 : index
    %c0_18 = arith.constant 0 : index
    %57 = vector.load %arg5[%c0_16, %c0_17, %c0_18] : memref<4x64x32xbf16, #tpu.memory_space<vmem>>, vector<4x64x32xbf16>
    "tpu.trace_start"() <{level = 10 : i32, message = "hnd,hde->hne"}> : () -> ()
    %cst_19 = arith.constant dense<0.000000e+00> : vector<4x8x32xf32>
    %58 = tpu.matmul %56, %57, %cst_19 {dimension_numbers = #tpu.dot_dimension_numbers<[2], [1], [1], [2], [0, 0, 0, 1, 1, 2], [0], [0]>} : vector<4x8x64xbf16>, vector<4x64x32xbf16>, vector<4x8x32xf32> -> vector<4x8x32xf32>
    "tpu.trace_stop"() : () -> ()
    %cst_20 = arith.constant dense<0.000000e+00> : vector<8x32xf32>
    %59 = vector.multi_reduction <add>, %58, %cst_20 [0] : vector<4x8x32xf32> to vector<8x32xf32>
    %60 = vector.broadcast %5 : vector<1x32xf32> to vector<8x32xf32>
    %61 = arith.addf %59, %60 : vector<8x32xf32>
    %62 = arith.addf %1, %61 : vector<8x32xf32>
    %cst_21 = arith.constant dense<0.000000e+00> : vector<8xf32>
    %63 = vector.multi_reduction <add>, %62, %cst_21 [1] : vector<8x32xf32> to vector<8xf32>
    %64 = vector.shape_cast %63 : vector<8xf32> to vector<8x1xf32>
    %cst_22 = arith.constant 3.200000e+01 : f32
    %65 = vector.broadcast %cst_22 : f32 to vector<8x1xf32>
    %66 = arith.divf %64, %65 : vector<8x1xf32>
    %67 = vector.broadcast %66 : vector<8x1xf32> to vector<8x32xf32>
    %68 = arith.subf %62, %67 : vector<8x32xf32>
    %69 = arith.mulf %68, %68 : vector<8x32xf32>
    %cst_23 = arith.constant dense<0.000000e+00> : vector<8xf32>
    %70 = vector.multi_reduction <add>, %69, %cst_23 [1] : vector<8x32xf32> to vector<8xf32>
    %71 = vector.shape_cast %70 : vector<8xf32> to vector<8x1xf32>
    %cst_24 = arith.constant 3.200000e+01 : f32
    %72 = vector.broadcast %cst_24 : f32 to vector<8x1xf32>
    %73 = arith.divf %71, %72 : vector<8x1xf32>
    %74 = vector.broadcast %66 : vector<8x1xf32> to vector<8x32xf32>
    %75 = arith.subf %62, %74 : vector<8x32xf32>
    %cst_25 = arith.constant 9.99999974E-6 : f32
    %76 = vector.broadcast %cst_25 : f32 to vector<8x1xf32>
    %77 = arith.addf %73, %76 : vector<8x1xf32>
    %78 = math.rsqrt %77 : vector<8x1xf32>
    %79 = vector.broadcast %78 : vector<8x1xf32> to vector<8x32xf32>
    %80 = arith.mulf %75, %79 : vector<8x32xf32>
    %81 = vector.broadcast %6 : vector<1x32xf32> to vector<8x32xf32>
    %82 = arith.mulf %80, %81 : vector<8x32xf32>
    %83 = vector.broadcast %7 : vector<1x32xf32> to vector<8x32xf32>
    %84 = arith.addf %82, %83 : vector<8x32xf32>
    %85 = arith.truncf %84 : vector<8x32xf32> to vector<8x32xbf16>
    %c0_26 = arith.constant 0 : index
    %c0_27 = arith.constant 0 : index
    %86 = vector.load %arg6[%c0_26, %c0_27] : memref<32x64xbf16, #tpu.memory_space<vmem>>, vector<32x64xbf16>
    %cst_28 = arith.constant dense<0.000000e+00> : vector<8x64xf32>
    %87 = tpu.matmul %85, %86, %cst_28 {dimension_numbers = #tpu.dot_dimension_numbers<[1], [0], [0], [1], [0, 0, 1, 1], [], []>} : vector<8x32xbf16>, vector<32x64xbf16>, vector<8x64xf32> -> vector<8x64xf32>
    %c0_29 = arith.constant 0 : index
    %c0_30 = arith.constant 0 : index
    %88 = vector.load %arg3[%c0_29, %c0_30] : memref<1x64xf32, #tpu.memory_space<vmem>>, vector<1x64xf32>
    %89 = vector.broadcast %88 : vector<1x64xf32> to vector<8x64xf32>
    %90 = arith.addf %87, %89 : vector<8x64xf32>
    %cst_31 = arith.constant 5.000000e-01 : f32
    %91 = vector.broadcast %cst_31 : f32 to vector<8x64xf32>
    %92 = arith.mulf %91, %90 : vector<8x64xf32>
    %93 = arith.mulf %90, %90 : vector<8x64xf32>
    %94 = arith.mulf %93, %90 : vector<8x64xf32>
    %cst_32 = arith.constant 4.471500e-02 : f32
    %95 = vector.broadcast %cst_32 : f32 to vector<8x64xf32>
    %96 = arith.mulf %95, %94 : vector<8x64xf32>
    %97 = arith.addf %90, %96 : vector<8x64xf32>
    %cst_33 = arith.constant 0.797884583 : f32
    %98 = vector.broadcast %cst_33 : f32 to vector<8x64xf32>
    %99 = arith.mulf %98, %97 : vector<8x64xf32>
    %100 = math.tanh %99 : vector<8x64xf32>
    %cst_34 = arith.constant 1.000000e+00 : f32
    %101 = vector.broadcast %cst_34 : f32 to vector<8x64xf32>
    %102 = arith.addf %101, %100 : vector<8x64xf32>
    %103 = arith.mulf %92, %102 : vector<8x64xf32>
    %104 = arith.truncf %103 : vector<8x64xf32> to vector<8x64xbf16>
    %c0_35 = arith.constant 0 : index
    %c0_36 = arith.constant 0 : index
    %105 = vector.load %arg7[%c0_35, %c0_36] : memref<64x32xbf16, #tpu.memory_space<vmem>>, vector<64x32xbf16>
    %cst_37 = arith.constant dense<0.000000e+00> : vector<8x32xf32>
    %106 = tpu.matmul %104, %105, %cst_37 {dimension_numbers = #tpu.dot_dimension_numbers<[1], [0], [0], [1], [0, 0, 1, 1], [], []>} : vector<8x64xbf16>, vector<64x32xbf16>, vector<8x32xf32> -> vector<8x32xf32>
    %107 = vector.broadcast %8 : vector<1x32xf32> to vector<8x32xf32>
    %108 = arith.addf %106, %107 : vector<8x32xf32>
    %109 = arith.addf %62, %108 : vector<8x32xf32>
    %c0_38 = arith.constant 0 : index
    %c0_39 = arith.constant 0 : index
    %c0_40 = arith.constant 0 : index
    %110 = vector.load %arg8[%c0_38, %c0_39, %c0_40] : memref<1x8x32xf32, #tpu.memory_space<vmem>>, vector<1x8x32xf32>
    %111 = vector.shape_cast %110 : vector<1x8x32xf32> to vector<8x32xf32>
    %112 = vector.shape_cast %109 : vector<8x32xf32> to vector<1x8x32xf32>
    tpu.vector_store %arg8[%c0_38, %c0_39, %c0_40], %112 {strides = array<i32>} : memref<1x8x32xf32, #tpu.memory_space<vmem>>, vector<1x8x32xf32>,
    return
  }
  func.func @transform_0(%arg0: i32) -> (i32, i32, i32) {
    %c0_i32 = arith.constant 0 : i32
    %c0_i32_0 = arith.constant 0 : i32
    %c0_i32_1 = arith.constant 0 : i32
    return %arg0, %c0_i32, %c0_i32_0 : i32, i32, i32
  }
  func.func @transform_1(%arg0: i32) -> (i32, i32) {
    %c0_i32 = arith.constant 0 : i32
    %c0_i32_0 = arith.constant 0 : i32
    %c0_i32_1 = arith.constant 0 : i32
    return %c0_i32, %c0_i32_0 : i32, i32
  }
  func.func @transform_2(%arg0: i32) -> (i32, i32) {
    %c0_i32 = arith.constant 0 : i32
    %c0_i32_0 = arith.constant 0 : i32
    %c0_i32_1 = arith.constant 0 : i32
    return %c0_i32, %c0_i32_0 : i32, i32
  }
  func.func @transform_3(%arg0: i32) -> (i32, i32, i32) {
    %c0_i32 = arith.constant 0 : i32
    %c0_i32_0 = arith.constant 0 : i32
    %c0_i32_1 = arith.constant 0 : i32
    %c0_i32_2 = arith.constant 0 : i32
    return %c0_i32, %c0_i32_0, %c0_i32_1 : i32, i32, i32
  }
  func.func @transform_4(%arg0: i32) -> (i32, i32, i32) {
    %c0_i32 = arith.constant 0 : i32
    %c0_i32_0 = arith.constant 0 : i32
    %c0_i32_1 = arith.constant 0 : i32
    %c0_i32_2 = arith.constant 0 : i32
    return %c0_i32, %c0_i32_0, %c0_i32_1 : i32, i32, i32
  }
  func.func @transform_5(%arg0: i32) -> (i32, i32) {
    %c0_i32 = arith.constant 0 : i32
    %c0_i32_0 = arith.constant 0 : i32
    %c0_i32_1 = arith.constant 0 : i32
    return %c0_i32, %c0_i32_0 : i32, i32
  }
  func.func @transform_6(%arg0: i32) -> (i32, i32) {
    %c0_i32 = arith.constant 0 : i32
    %c0_i32_0 = arith.constant 0 : i32
    %c0_i32_1 = arith.constant 0 : i32
    return %c0_i32, %c0_i32_0 : i32, i32
  }
  func.func @transform_7(%arg0: i32) -> (i32, i32, i32) {
    %c0_i32 = arith.constant 0 : i32
    %c0_i32_0 = arith.constant 0 : i32
    %c0_i32_1 = arith.constant 0 : i32
    return %arg0, %c0_i32, %c0_i32_0 : i32, i32, i32
  }
}

module attributes {stable_mosaic.version = 11 : i64} {
  func.func @_layer_kernel(%arg0: i32, %arg1: memref<1x8x32xf32, #tpu.memory_space<vmem>>, %arg2: memref<6x32xf32, #tpu.memory_space<vmem>>, %arg3: memref<1x64xf32, #tpu.memory_space<vmem>>, %arg4: memref<12x32x64xbf16, #tpu.memory_space<vmem>>, %arg5: memref<4x64x32xbf16, #tpu.memory_space<vmem>>, %arg6: memref<32x64xbf16, #tpu.memory_space<vmem>>, %arg7: memref<64x32xbf16, #tpu.memory_space<vmem>>, %arg8: memref<1x8x32xf32, #tpu.memory_space<vmem>>) attributes {dimension_semantics = [#tpu.dimension_semantics<parallel>], iteration_bounds = array<i64: 2>, scalar_prefetch = 0 : i64, scratch_operands = 0 : i64, tpu.core_type = #tpu.core_type<tc>, window_params = [{transform_indices = @transform_0, window_bounds = array<i64: 1, 8, 32>}, {pipeline_mode = #tpu.pipeline_mode<synchronous>, transform_indices = @transform_1, window_bounds = array<i64: 6, 32>}, {pipeline_mode = #tpu.pipeline_mode<synchronous>, transform_indices = @transform_2, window_bounds = array<i64: 1, 64>}, {pipeline_mode = #tpu.pipeline_mode<synchronous>, transform_indices = @transform_3, window_bounds = array<i64: 12, 32, 64>}, {pipeline_mode = #tpu.pipeline_mode<synchronous>, transform_indices = @transform_4, window_bounds = array<i64: 4, 64, 32>}, {pipeline_mode = #tpu.pipeline_mode<synchronous>, transform_indices = @transform_5, window_bounds = array<i64: 32, 64>}, {pipeline_mode = #tpu.pipeline_mode<synchronous>, transform_indices = @transform_6, window_bounds = array<i64: 64, 32>}, {transform_indices = @transform_7, window_bounds = array<i64: 1, 8, 32>}]} {
    %c0 = arith.constant 0 : index
    %c0_0 = arith.constant 0 : index
    %c0_1 = arith.constant 0 : index
    %0 = vector.load %arg1[%c0, %c0_0, %c0_1] : memref<1x8x32xf32, #tpu.memory_space<vmem>>, vector<1x8x32xf32>
    %1 = vector.shape_cast %0 : vector<1x8x32xf32> to vector<8x32xf32>
    %c0_2 = arith.constant 0 : index
    %c0_3 = arith.constant 0 : index
    %2 = vector.load %arg2[%c0_2, %c0_3] : memref<6x32xf32, #tpu.memory_space<vmem>>, vector<6x32xf32>
    %3 = vector.extract_strided_slice %2 {offsets = [0, 0], sizes = [1, 32], strides = [1, 1]} : vector<6x32xf32> to vector<1x32xf32>
    %4 = vector.extract_strided_slice %2 {offsets = [1, 0], sizes = [1, 32], strides = [1, 1]} : vector<6x32xf32> to vector<1x32xf32>
    %5 = vector.extract_strided_slice %2 {offsets = [2, 0], sizes = [1, 32], strides = [1, 1]} : vector<6x32xf32> to vector<1x32xf32>
    %6 = vector.extract_strided_slice %2 {offsets = [3, 0], sizes = [1, 32], strides = [1, 1]} : vector<6x32xf32> to vector<1x32xf32>
    %7 = vector.extract_strided_slice %2 {offsets = [4, 0], sizes = [1, 32], strides = [1, 1]} : vector<6x32xf32> to vector<1x32xf32>
    %8 = vector.extract_strided_slice %2 {offsets = [5, 0], sizes = [1, 32], strides = [1, 1]} : vector<6x32xf32> to vector<1x32xf32>
    %cst = arith.constant dense<0.000000e+00> : vector<8xf32>
    %9 = vector.multi_reduction <add>, %1, %cst [1] : vector<8x32xf32> to vector<8xf32>
    %10 = vector.shape_cast %9 : vector<8xf32> to vector<8x1xf32>
    %cst_4 = arith.constant 3.200000e+01 : f32
    %11 = vector.broadcast %cst_4 : f32 to vector<8x1xf32>
    %12 = arith.divf %10, %11 : vector<8x1xf32>
    %13 = vector.broadcast %12 : vector<8x1xf32> to vector<8x32xf32>
    %14 = arith.subf %1, %13 : vector<8x32xf32>
    %15 = arith.mulf %14, %14 : vector<8x32xf32>
    %cst_5 = arith.constant dense<0.000000e+00> : vector<8xf32>
    %16 = vector.multi_reduction <add>, %15, %cst_5 [1] : vector<8x32xf32> to vector<8xf32>
    %17 = vector.shape_cast %16 : vector<8xf32> to vector<8x1xf32>
    %cst_6 = arith.constant 3.200000e+01 : f32
    %18 = vector.broadcast %cst_6 : f32 to vector<8x1xf32>
    %19 = arith.divf %17, %18 : vector<8x1xf32>
    %20 = vector.broadcast %12 : vector<8x1xf32> to vector<8x32xf32>
    %21 = arith.subf %1, %20 : vector<8x32xf32>
    %cst_7 = arith.constant 9.99999974E-6 : f32
    %22 = vector.broadcast %cst_7 : f32 to vector<8x1xf32>
    %23 = arith.addf %19, %22 : vector<8x1xf32>
    %24 = math.rsqrt %23 : vector<8x1xf32>
    %25 = vector.broadcast %24 : vector<8x1xf32> to vector<8x32xf32>
    %26 = arith.mulf %21, %25 : vector<8x32xf32>
    %27 = vector.broadcast %3 : vector<1x32xf32> to vector<8x32xf32>
    %28 = arith.mulf %26, %27 : vector<8x32xf32>
    %29 = vector.broadcast %4 : vector<1x32xf32> to vector<8x32xf32>
    %30 = arith.addf %28, %29 : vector<8x32xf32>
    %31 = arith.truncf %30 : vector<8x32xf32> to vector<8x32xbf16>
    %32 = vector.shape_cast %31 : vector<8x32xbf16> to vector<1x8x32xbf16>
    %33 = vector.shape_cast %32 : vector<1x8x32xbf16> to vector<1x8x32xbf16>
    %34 = vector.broadcast %33 : vector<1x8x32xbf16> to vector<12x8x32xbf16>
    %c0_8 = arith.constant 0 : index
    %c0_9 = arith.constant 0 : index
    %c0_10 = arith.constant 0 : index
    %35 = vector.load %arg4[%c0_8, %c0_9, %c0_10] : memref<12x32x64xbf16, #tpu.memory_space<vmem>>, vector<12x32x64xbf16>
    "tpu.trace_start"() <{level = 10 : i32, message = "hnd,hde->hne"}> : () -> ()
    %cst_11 = arith.constant dense<0.000000e+00> : vector<12x8x64xf32>
    %36 = tpu.matmul %34, %35, %cst_11 {dimension_numbers = #tpu.dot_dimension_numbers<[2], [1], [1], [2], [0, 0, 0, 1, 1, 2], [0], [0]>} : vector<12x8x32xbf16>, vector<12x32x64xbf16>, vector<12x8x64xf32> -> vector<12x8x64xf32>
    "tpu.trace_stop"() : () -> ()
    %37 = vector.extract_strided_slice %36 {offsets = [0, 0, 0], sizes = [4, 8, 64], strides = [1, 1, 1]} : vector<12x8x64xf32> to vector<4x8x64xf32>
    %38 = arith.truncf %37 : vector<4x8x64xf32> to vector<4x8x64xbf16>
    %39 = vector.extract_strided_slice %36 {offsets = [4, 0, 0], sizes = [4, 8, 64], strides = [1, 1, 1]} : vector<12x8x64xf32> to vector<4x8x64xf32>
    %40 = arith.truncf %39 : vector<4x8x64xf32> to vector<4x8x64xbf16>
    %41 = vector.extract_strided_slice %36 {offsets = [8, 0, 0], sizes = [4, 8, 64], strides = [1, 1, 1]} : vector<12x8x64xf32> to vector<4x8x64xf32>
    %42 = arith.truncf %41 : vector<4x8x64xf32> to vector<4x8x64xbf16>
    "tpu.trace_start"() <{level = 10 : i32, message = "hqd,hkd->hqk"}> : () -> ()
    %cst_12 = arith.constant dense<0.000000e+00> : vector<4x8x8xf32>
    %43 = tpu.matmul %38, %40, %cst_12 {dimension_numbers = #tpu.dot_dimension_numbers<[2], [2], [1], [1], [0, 0, 0, 1, 1, 1], [0], [0]>} : vector<4x8x64xbf16>, vector<4x8x64xbf16>, vector<4x8x8xf32> -> vector<4x8x8xf32>
    "tpu.trace_stop"() : () -> ()
    %cst_13 = arith.constant dense<0xFF800000> : vector<4x8xf32>
    %44 = vector.multi_reduction <maximumf>, %43, %cst_13 [2] : vector<4x8x8xf32> to vector<4x8xf32>
    %45 = vector.shape_cast %44 : vector<4x8xf32> to vector<4x8x1xf32>
    %46 = vector.broadcast %45 : vector<4x8x1xf32> to vector<4x8x8xf32>
    %47 = arith.subf %43, %46 : vector<4x8x8xf32>
    %48 = math.exp %47 : vector<4x8x8xf32>
    %cst_14 = arith.constant dense<0.000000e+00> : vector<4x8xf32>
    %49 = vector.multi_reduction <add>, %48, %cst_14 [2] : vector<4x8x8xf32> to vector<4x8xf32>
    %50 = vector.shape_cast %49 : vector<4x8xf32> to vector<4x8x1xf32>
    %51 = arith.truncf %48 : vector<4x8x8xf32> to vector<4x8x8xbf16>
    "tpu.trace_start"() <{level = 10 : i32, message = "hqk,hkd->hqd"}> : () -> ()
    %cst_15 = arith.constant dense<0.000000e+00> : vector<4x8x64xf32>
    %52 = tpu.matmul %51, %42, %cst_15 {dimension_numbers = #tpu.dot_dimension_numbers<[2], [1], [1], [2], [0, 0, 0, 1, 1, 2], [0], [0]>} : vector<4x8x8xbf16>, vector<4x8x64xbf16>, vector<4x8x64xf32> -> vector<4x8x64xf32>
    "tpu.trace_stop"() : () -> ()
    %53 = tpu.reciprocal %50 {approx = true} : vector<4x8x1xf32> -> vector<4x8x1xf32>
    %54 = vector.broadcast %53 : vector<4x8x1xf32> to vector<4x8x64xf32>
    %55 = arith.mulf %52, %54 : vector<4x8x64xf32>
    %56 = arith.truncf %55 : vector<4x8x64xf32> to vector<4x8x64xbf16>
    %c0_16 = arith.constant 0 : index
    %c0_17 = arith.constant 0 : index
    %c0_18 = arith.constant 0 : index
    %57 = vector.load %arg5[%c0_16, %c0_17, %c0_18] : memref<4x64x32xbf16, #tpu.memory_space<vmem>>, vector<4x64x32xbf16>
    "tpu.trace_start"() <{level = 10 : i32, message = "hnd,hde->hne"}> : () -> ()
    %cst_19 = arith.constant dense<0.000000e+00> : vector<4x8x32xf32>
    %58 = tpu.matmul %56, %57, %cst_19 {dimension_numbers = #tpu.dot_dimension_numbers<[2], [1], [1], [2], [0, 0, 0, 1, 1, 2], [0], [0]>} : vector<4x8x64xbf16>, vector<4x64x32xbf16>, vector<4x8x32xf32> -> vector<4x8x32xf32>
    "tpu.trace_stop"() : () -> ()
    %cst_20 = arith.constant dense<0.000000e+00> : vector<8x32xf32>
    %59 = vector.multi_reduction <add>, %58, %cst_20 [0] : vector<4x8x32xf32> to vector<8x32xf32>
    %60 = vector.broadcast %5 : vector<1x32xf32> to vector<8x32xf32>
    %61 = arith.addf %59, %60 : vector<8x32xf32>
    %62 = arith.addf %1, %61 : vector<8x32xf32>
    %cst_21 = arith.constant dense<0.000000e+00> : vector<8xf32>
    %63 = vector.multi_reduction <add>, %62, %cst_21 [1] : vector<8x32xf32> to vector<8xf32>
    %64 = vector.shape_cast %63 : vector<8xf32> to vector<8x1xf32>
    %cst_22 = arith.constant 3.200000e+01 : f32
    %65 = vector.broadcast %cst_22 : f32 to vector<8x1xf32>
    %66 = arith.divf %64, %65 : vector<8x1xf32>
    %67 = vector.broadcast %66 : vector<8x1xf32> to vector<8x32xf32>
    %68 = arith.subf %62, %67 : vector<8x32xf32>
    %69 = arith.mulf %68, %68 : vector<8x32xf32>
    %cst_23 = arith.constant dense<0.000000e+00> : vector<8xf32>
    %70 = vector.multi_reduction <add>, %69, %cst_23 [1] : vector<8x32xf32> to vector<8xf32>
    %71 = vector.shape_cast %70 : vector<8xf32> to vector<8x1xf32>
    %cst_24 = arith.constant 3.200000e+01 : f32
    %72 = vector.broadcast %cst_24 : f32 to vector<8x1xf32>
    %73 = arith.divf %71, %72 : vector<8x1xf32>
    %74 = vector.broadcast %66 : vector<8x1xf32> to vector<8x32xf32>
    %75 = arith.subf %62, %74 : vector<8x32xf32>
    %cst_25 = arith.constant 9.99999974E-6 : f32
    %76 = vector.broadcast %cst_25 : f32 to vector<8x1xf32>
    %77 = arith.addf %73, %76 : vector<8x1xf32>
    %78 = math.rsqrt %77 : vector<8x1xf32>
    %79 = vector.broadcast %78 : vector<8x1xf32> to vector<8x32xf32>
    %80 = arith.mulf %75, %79 : vector<8x32xf32>
    %81 = vector.broadcast %6 : vector<1x32xf32> to vector<8x32xf32>
    %82 = arith.mulf %80, %81 : vector<8x32xf32>
    %83 = vector.broadcast %7 : vector<1x32xf32> to vector<8x32xf32>
    %84 = arith.addf %82, %83 : vector<8x32xf32>
    %85 = arith.truncf %84 : vector<8x32xf32> to vector<8x32xbf16>
    %c0_26 = arith.constant 0 : index
    %c0_27 = arith.constant 0 : index
    %86 = vector.load %arg6[%c0_26, %c0_27] : memref<32x64xbf16, #tpu.memory_space<vmem>>, vector<32x64xbf16>
    %cst_28 = arith.constant dense<0.000000e+00> : vector<8x64xf32>
    %87 = tpu.matmul %85, %86, %cst_28 {dimension_numbers = #tpu.dot_dimension_numbers<[1], [0], [0], [1], [0, 0, 1, 1], [], []>} : vector<8x32xbf16>, vector<32x64xbf16>, vector<8x64xf32> -> vector<8x64xf32>
    %c0_29 = arith.constant 0 : index
    %c0_30 = arith.constant 0 : index
    %88 = vector.load %arg3[%c0_29, %c0_30] : memref<1x64xf32, #tpu.memory_space<vmem>>, vector<1x64xf32>
    %89 = vector.broadcast %88 : vector<1x64xf32> to vector<8x64xf32>
    %90 = arith.addf %87, %89 : vector<8x64xf32>
    %cst_31 = arith.constant 5.000000e-01 : f32
    %91 = vector.broadcast %cst_31 : f32 to vector<8x64xf32>
    %92 = arith.mulf %91, %90 : vector<8x64xf32>
    %93 = arith.mulf %90, %90 : vector<8x64xf32>
    %94 = arith.mulf %93, %90 : vector<8x64xf32>
    %cst_32 = arith.constant 4.471500e-02 : f32
    %95 = vector.broadcast %cst_32 : f32 to vector<8x64xf32>
    %96 = arith.mulf %95, %94 : vector<8x64xf32>
    %97 = arith.addf %90, %96 : vector<8x64xf32>
    %cst_33 = arith.constant 0.797884583 : f32
    %98 = vector.broadcast %cst_33 : f32 to vector<8x64xf32>
    %99 = arith.mulf %98, %97 : vector<8x64xf32>
    %100 = math.tanh %99 : vector<8x64xf32>
    %cst_34 = arith.constant 1.000000e+00 : f32
    %101 = vector.broadcast %cst_34 : f32 to vector<8x64xf32>
    %102 = arith.addf %101, %100 : vector<8x64xf32>
    %103 = arith.mulf %92, %102 : vector<8x64xf32>
    %104 = arith.truncf %103 : vector<8x64xf32> to vector<8x64xbf16>
    %c0_35 = arith.constant 0 : index
    %c0_36 = arith.constant 0 : index
    %105 = vector.load %arg7[%c0_35, %c0_36] : memref<64x32xbf16, #tpu.memory_space<vmem>>, vector<64x32xbf16>
    %cst_37 = arith.constant dense<0.000000e+00> : vector<8x32xf32>
    %106 = tpu.matmul %104, %105, %cst_37 {dimension_numbers = #tpu.dot_dimension_numbers<[1], [0], [0], [1], [0, 0, 1, 1], [], []>} : vector<8x64xbf16>, vector<64x32xbf16>, vector<8x32xf32> -> vector<8x32xf32>
    %107 = vector.broadcast %8 : vector<1x32xf32> to vector<8x32xf32>
    %108 = arith.addf %106, %107 : vector<8x32xf32>
    %109 = arith.addf %62, %108 : vector<8x32xf32>
    %c0_38 = arith.constant 0 : index
    %c0_39 = arith.constant 0 : index
    %c0_40 = arith.constant 0 : index
    %110 = vector.load %arg8[%c0_38, %c0_39, %c0_40] : memref<1x8x32xf32, #tpu.memory_space<vmem>>, vector<1x8x32xf32>
    %111 = vector.shape_cast %110 : vector<1x8x32xf32> to vector<8x32xf32>
    %112 = vector.shape_cast %109 : vector<8x32xf32> to vector<1x8x32xf32>
    tpu.vector_store %arg8[%c0_38, %c0_39, %c0_40], %112 {strides = array<i32>} : memref<1x8x32xf32, #tpu.memory_space<vmem>>, vector<1x8x32xf32>,
    return
  }
  func.func @transform_0(%arg0: i32) -> (i32, i32, i32) {
    %c0_i32 = arith.constant 0 : i32
    %c0_i32_0 = arith.constant 0 : i32
    %c0_i32_1 = arith.constant 0 : i32
    return %arg0, %c0_i32, %c0_i32_0 : i32, i32, i32
  }
  func.func @transform_1(%arg0: i32) -> (i32, i32) {
    %c0_i32 = arith.constant 0 : i32
    %c0_i32_0 = arith.constant 0 : i32
    %c0_i32_1 = arith.constant 0 : i32
    return %c0_i32, %c0_i32_0 : i32, i32
  }
  func.func @transform_2(%arg0: i32) -> (i32, i32) {
    %c0_i32 = arith.constant 0 : i32
    %c0_i32_0 = arith.constant 0 : i32
    %c0_i32_1 = arith.constant 0 : i32
    return %c0_i32, %c0_i32_0 : i32, i32
  }
  func.func @transform_3(%arg0: i32) -> (i32, i32, i32) {
    %c0_i32 = arith.constant 0 : i32
    %c0_i32_0 = arith.constant 0 : i32
    %c0_i32_1 = arith.constant 0 : i32
    %c0_i32_2 = arith.constant 0 : i32
    return %c0_i32, %c0_i32_0, %c0_i32_1 : i32, i32, i32
  }
  func.func @transform_4(%arg0: i32) -> (i32, i32, i32) {
    %c0_i32 = arith.constant 0 : i32
    %c0_i32_0 = arith.constant 0 : i32
    %c0_i32_1 = arith.constant 0 : i32
    %c0_i32_2 = arith.constant 0 : i32
    return %c0_i32, %c0_i32_0, %c0_i32_1 : i32, i32, i32
  }
  func.func @transform_5(%arg0: i32) -> (i32, i32) {
    %c0_i32 = arith.constant 0 : i32
    %c0_i32_0 = arith.constant 0 : i32
    %c0_i32_1 = arith.constant 0 : i32
    return %c0_i32, %c0_i32_0 : i32, i32
  }
  func.func @transform_6(%arg0: i32) -> (i32, i32) {
    %c0_i32 = arith.constant 0 : i32
    %c0_i32_0 = arith.constant 0 : i32
    %c0_i32_1 = arith.constant 0 : i32
    return %c0_i32, %c0_i32_0 : i32, i32
  }
  func.func @transform_7(%arg0: i32) -> (i32, i32, i32) {
    %c0_i32 = arith.constant 0 : i32
    %c0_i32_0 = arith.constant 0 : i32
    %c0_i32_1 = arith.constant 0 : i32
    return %arg0, %c0_i32, %c0_i32_0 : i32, i32, i32
  }
}

</mosaic_0001>

<bundles_post_ra>
// kernel: transformer_forward.2
= control target key start
LH: loop header
LB: loop body
LE: loop exit
PB: predicated region body
PF: predicated region fallthrough
CT: control target
= control target key end

     0   :  { %12 = vsyncpa [#allocation3], 0  ;;  %s1690_s24 = smov 0   ;;  %s1864_s0 = inlined_call_operand.vmem [shape: f32[2,8,32], index: 0, kind: input, shape index: {}]   ;;  %s1865_s1 = inlined_call_operand.vmem [shape: f32[6,32], index: 1, kind: input, shape index: {}]   ;;  %s1866_s2 = inlined_call_operand.vmem [shape: f32[1,64], index: 2, kind: input, shape index: {}]   ;;  %s1867_s3 = inlined_call_operand.hbm [shape: bf16[12,32,64], index: 3, kind: input, shape index: {}]   ;;  %s1868_s4 = inlined_call_operand.vmem [shape: bf16[4,64,32], index: 4, kind: input, shape index: {}]   ;;  %s1869_s5 = inlined_call_operand.vmem [shape: bf16[32,64], index: 5, kind: input, shape index: {}]   ;;  %s1870_s6 = inlined_call_operand.vmem [shape: bf16[64,32], index: 6, kind: input, shape index: {}]   ;;  %s1871_s7 = inlined_call_operand.vmem [shape: f32[2,8,32], index: 7, kind: output, shape index: {}]  }
   0x1 LB: > { %s218_s27 = sshll.u32 %s1867_s3, 4  ;;  %s1290_s28 = sadd.s32 4294967295, %s1644_s24   ;;  %s1644_s24 = sphi %s1690_s24, %s18_s24   ;;  %s219_s27 = int_to_ptr.hbm [resolvable:$true] %s218_s27 }
   0x2   : > { %p1292_p0 = scmp.ge.s32.totalorder %s1644_s24, 1  ;;  %p201_p1 = scmp.lt.s32.totalorder %s1644_s24, 3 }
   0x3   : > { %p1565_p2 = scmp.eq.s32.totalorder %s1290_s28, 0  ;;  %s1646_s29 = smov [#allocation2]  }
   0x4   : > { %p202_p3 = pnand %p1292_p0, %p201_p1  ;;  %s220_s30 = sshll.u32 %s1646_s29, 4  ;;  %s221_s30 = int_to_ptr.vmem [resolvable:$true] %s220_s30 }
   0x5   : > { %s1647_s8 = smov 64   ;;  %s1648_s9 = smov 4  }
   0x6   : > { %p1561_p4 = pneg %p202_p3  ;;  %252 = sbr.rel (%p202_p3) target bundleno = 1547 (0x60b), region = 48 }
   0x8   : > { %p1562_p5 = pnand %p1565_p2, %p1561_p4 }
   0xa   : > { %1564 = dma.hbm_to_vmem [thread:$0]  (!%p1562_p5), %s219_s27, 3072, %s221_s30, [#allocation3], %s1647_s8, %s1647_s8, %s1648_s9  }
   0xb   : > { %1639 = dma.done.wait (%p1565_p2), [#allocation3], 3072  }
   0xc   : > { %1641 = vsyncadd (%p1565_p2), [#allocation3], 4294964224  ;;  %p283_p6 = scmp.lt.s32.totalorder %s1290_s28, 1  ;;  %vm294_vm0 = vcmask 261120   ;;  %v1649_v2 = vmov 32.0   ;;  %v1512_v14 = vld [vmem:[#allocation2 + $0x8] sm:$0xff] }
   0xd   : > { %1580 = vrcp.f32 %v1649_v2  ;;  %v1514_v15 = vld [vmem:[#allocation2 + $0x18] sm:$0xff]  ;;  %v1516_v16 = vld [vmem:[#allocation2 + $0x28] sm:$0xff]  ;;  %398 = vmatpush.bf16.msra.mxu0 %v1512_v14  ;;  %v1511_v18 = vld [vmem:[#allocation2] sm:$0xff]  ;;  %vm692_vm5 = vcmask 523264   ;;  %vm813_vm6 = vcmask 1043456   ;;  %vm769_vm7 = vcmask 64512  }
   0xe   : > { %s1873_s28 = smov (!%p283_p6, %s1290_s28), 1  ;;  %v1518_v17 = vld [vmem:[#allocation2 + $0x38] sm:$0xff]  ;;  %423 = vmatpush.bf16.msra.mxu1 %v1514_v15  ;;  %448 = vmatpush.bf16.msra.mxu2 %v1516_v16  ;;  %v1513_v19 = vld [vmem:[#allocation2 + $0x10] sm:$0xff]  ;;  %v1515_v20 = vld [vmem:[#allocation2 + $0x20] sm:$0xff] }
   0xf   : > { %s1297_s10 = sshll.u32 %s1873_s28, 3  ;;  %473 = vmatpush.bf16.msra.mxu3 %v1518_v17  ;;  %v1517_v21 = vld [vmem:[#allocation2 + $0x30] sm:$0xff]  ;;  %v1520_v23 = vld [vmem:[#allocation2 + $0x48] sm:$0xff]  ;;  %v1522_v24 = vld [vmem:[#allocation2 + $0x58] sm:$0xff] }
  0x10   : > { %s286_s13 = scalar_lea.vmem %s1864_s0, %s1297_s10  ;;  %v1524_v25 = vld [vmem:[#allocation2 + $0x68] sm:$0xff]  ;;  %v1526_v27 = vld [vmem:[#allocation2 + $0x78] sm:$0xff]  ;;  %v1519_v28 = vld [vmem:[#allocation2 + $0x40] sm:$0xff]  ;;  %s290_s25 = scalar_lea.vmem %s1871_s7, %s1297_s10 }
  0x11   : > { %v1709_v0 = vld [vmem:[%s286_s13] sm:$0xff]  ;;  %399 = vmatpush.bf16.msra.mxu0 %v1511_v18  ;;  %v1521_v29 = vld [vmem:[#allocation2 + $0x50] sm:$0xff]  ;;  %v1528_v47 = vld [vmem:[#allocation2 + $0x88] sm:$0xff] }
  0x12   : > { %v295_v1 = vsel %vm294_vm0, %v1709_v0, 0.0  ;;  %424 = vmatpush.bf16.msra.mxu1 %v1513_v19  ;;  %449 = vmatpush.bf16.msra.mxu2 %v1515_v20  ;;  %v1523_v31 = vld [vmem:[#allocation2 + $0x60] sm:$0xff]  ;;  %v1525_v32 = vld [vmem:[#allocation2 + $0x70] sm:$0xff]  ;;  %v1530_v48 = vld [vmem:[#allocation2 + $0x98] sm:$0xff] }
  0x13   : > { %296 = vadd.xlane.f32.xlu0 %v295_v1  ;;  %v1581_v3 = vpop.eup %1580  ;;  %474 = vmatpush.bf16.msra.mxu3 %v1517_v21  ;;  %v1722_v37 = vld [vmem:[%s1865_s1] sm:$0x3f]  ;;  %v1532_v49 = vld [vmem:[#allocation2 + $0xa8] sm:$0xff]  ;;  %v1534_v50 = vld [vmem:[#allocation2 + $0xb8] sm:$0xff] }
  0x14   : > { %v299_v4 = vmul.f32 32.0, %v1581_v3  ;;  %vm303_vm1 = vweird.f32 %v1581_v3  ;;  %v324_v40 = vperm.slane %v1722_v37, 0  ;;  %v326_v42 = vperm.slane %v1722_v37, 1  ;;  %v1527_v51 = vld [vmem:[#allocation2 + $0x80] sm:$0xff]  ;;  %v1529_v52 = vld [vmem:[#allocation2 + $0x90] sm:$0xff] }
  0x15   : > { %498 = vmatpush.bf16.msrb.mxu0 %v1520_v23  ;;  %v1531_v53 = vld [vmem:[#allocation2 + $0xa0] sm:$0xff]  ;;  %v1533_v54 = vld [vmem:[#allocation2 + $0xb0] sm:$0xff] }
  0x16   : > { %v300_v5 = vsub.f32 1.0, %v299_v4  ;;  %523 = vmatpush.bf16.msrb.mxu1 %v1522_v24  ;;  %548 = vmatpush.bf16.msrb.mxu2 %v1524_v25 }
  0x17   : > { %573 = vmatpush.bf16.msrb.mxu3 %v1526_v27 }
  0x18   : > { %v301_v6 = vmul.f32 %v1581_v3, %v300_v5 }
  0x19   : > { %499 = vmatpush.bf16.msrb.mxu0 %v1519_v28 }
  0x1a   : > { %v302_v7 = vadd.f32 %v1581_v3, %v301_v6  ;;  %524 = vmatpush.bf16.msrb.mxu1 %v1521_v29  ;;  %549 = vmatpush.bf16.msrb.mxu2 %v1523_v31 }
  0x1b   : > { %574 = vmatpush.bf16.msrb.mxu3 %v1525_v32 }
  0x1c   : > { %v1713_v8 = vsel %vm303_vm1, %v1581_v3, %v302_v7 }
  0x86   : > { %v297_v9 = vpop.xlane.xlu0 %296 }
  0x87   : > { %v305_v10 = vmul.f32 %v1713_v8, %v297_v9 }
  0x89   : > { %v306_v11 = vsub.f32 %v1709_v0, %v305_v10 }
  0x8b   : > { %v307_v12 = vmul.f32 %v306_v11, %v306_v11 }
  0x8d   : > { %v308_v13 = vsel %vm294_vm0, %v307_v12, 0.0 }
  0x8e   : > { %309 = vadd.xlane.f32.xlu0 %v308_v13 }
 0x101   : > { %v310_v22 = vpop.xlane.xlu0 %309 }
 0x102   : > { %v311_v26 = vmul.f32 %v310_v22, %v1713_v8 }
 0x104   : > { %v312_v30 = vadd.f32 1e-05, %v311_v26 }
 0x106   : > { %1582 = vrsqrt.f32 %v312_v30  ;;  %vm319_vm3 = vweird.f32 %v312_v30 }
 0x10c   : > { %v1583_v33 = vpop.eup %1582 }
 0x10d   : > { %v314_v34 = vmul.f32 %v1583_v33, %v312_v30  ;;  %vm320_vm2 = vweird.f32 %v1583_v33 }
 0x10e   : > { %vm321_vm4 = vmor %vm319_vm3, %vm320_vm2 }
 0x10f   : > { %v315_v35 = vmul.f32 %v1583_v33, %v314_v34 }
 0x111   : > { %v316_v36 = vmul.f32 0.5, %v315_v35 }
 0x113   : > { %v317_v38 = vsub.f32 1.5, %v316_v36 }
 0x115   : > { %v318_v39 = vmul.f32 %v1583_v33, %v317_v38 }
 0x117   : > { %v322_v41 = vsel %vm321_vm4, %v1583_v33, %v318_v39 }
 0x118   : > { %v323_v43 = vmul.f32 %v322_v41, %v306_v11 }
 0x11a   : > { %v325_v44 = vmul.f32 %v324_v40, %v323_v43 }
 0x11c   : > { %v327_v45 = vadd.f32 %v326_v42, %v325_v44 }
 0x11e   : > { %v328_v46 = vpack.c.bf16 %v327_v45, %v327_v45 }
 0x120   : > { %1307 = vmatmul.msk.bf16.vlgmr.msra.gmra.mxu0 %vm294_vm0, %v328_v46  ;;  %1316 = vmatmul.msk.bf16.vlgmr.msra.gmra.mxu1 %vm294_vm0, %v328_v46 }
 0x121   : > { %1325 = vmatmul.msk.bf16.vlgmr.msra.gmra.mxu2 %vm294_vm0, %v328_v46  ;;  %1334 = vmatmul.msk.bf16.vlgmr.msra.gmra.mxu3 %vm294_vm0, %v328_v46 }
 0x122   : > { %598 = vmatpush.bf16.msra.mxu0 %v1528_v47  ;;  %623 = vmatpush.bf16.msra.mxu1 %v1530_v48 }
 0x123   : > { %648 = vmatpush.bf16.msra.mxu2 %v1532_v49  ;;  %673 = vmatpush.bf16.msra.mxu3 %v1534_v50 }
 0x126   : > { %599 = vmatpush.bf16.msra.mxu0 %v1527_v51  ;;  %624 = vmatpush.bf16.msra.mxu1 %v1529_v52 }
 0x127   : > { %649 = vmatpush.bf16.msra.mxu2 %v1531_v53  ;;  %674 = vmatpush.bf16.msra.mxu3 %v1533_v54 }
 0x130   : > { %1343 = vmatmul.msk.bf16.vlgmr.msrb.gmra.mxu0 %vm294_vm0, %v328_v46  ;;  %1352 = vmatmul.msk.bf16.vlgmr.msrb.gmra.mxu1 %vm294_vm0, %v328_v46 }
 0x131   : > { %1361 = vmatmul.msk.bf16.vlgmr.msrb.gmra.mxu2 %vm294_vm0, %v328_v46  ;;  %1370 = vmatmul.msk.bf16.vlgmr.msrb.gmra.mxu3 %vm294_vm0, %v328_v46 }
 0x140   : > { %1379 = vmatmul.msk.bf16.vlgmr.msra.gmra.mxu0 %vm294_vm0, %v328_v46  ;;  %1388 = vmatmul.msk.bf16.vlgmr.msra.gmra.mxu1 %vm294_vm0, %v328_v46 }
 0x141   : > { %1397 = vmatmul.msk.bf16.vlgmr.msra.gmra.mxu2 %vm294_vm0, %v328_v46  ;;  %1406 = vmatmul.msk.bf16.vlgmr.msra.gmra.mxu3 %vm294_vm0, %v328_v46 }
 0x19d   : > { %v401_v55 = vpop.f32.mrf.mxu0  ;;  %v426_v56 = vpop.f32.mrf.mxu1 }
 0x19e   : > { %v680_v13 = vpack.c.bf16 %v401_v55, %v401_v55  ;;  %v681_v14 = vpack.c.bf16 %v426_v56, %v426_v56 }
 0x1a4   : > { %v451_v57 = vpop.f32.mrf.mxu2  ;;  %v476_v58 = vpop.f32.mrf.mxu3 }
 0x1a5   : > { %v403_v59 = vpop.f32.mrf.mxu0  ;;  %v428_v60 = vpop.f32.mrf.mxu1  ;;  %v682_v19 = vpack.c.bf16 %v451_v57, %v451_v57  ;;  %v683_v20 = vpack.c.bf16 %v476_v58, %v476_v58 }
 0x1ac   : > { %v453_v61 = vpop.f32.mrf.mxu2  ;;  %v478_v62 = vpop.f32.mrf.mxu3 }
 0x1ad   : > { %v501_v63 = vpop.f32.mrf.mxu0  ;;  %v526_v1 = vpop.f32.mrf.mxu1 }
 0x1ae   : > { %v684_v2 = vpack.c.bf16 %v501_v63, %v501_v63  ;;  %v685_v3 = vpack.c.bf16 %v526_v1, %v526_v1 }
 0x1b0   : > { %v697_v4 = vsel %vm692_vm5, %v684_v2, 0  ;;  %v716_v5 = vsel %vm692_vm5, %v685_v3, 0 }
 0x1b1   : > { %706 = vmatpush.bf16.xpose.msrb.mxu0 %v697_v4  ;;  %725 = vmatpush.bf16.xpose.msrb.mxu1 %v716_v5 }
 0x1b4   : > { %v551_v6 = vpop.f32.mrf.mxu2  ;;  %v576_v7 = vpop.f32.mrf.mxu3 }
 0x1b5   : > { %v686_v9 = vpack.c.bf16 %v551_v6, %v551_v6  ;;  %v687_v10 = vpack.c.bf16 %v576_v7, %v576_v7  ;;  %v503_v11 = vpop.f32.mrf.mxu0  ;;  %v528_v12 = vpop.f32.mrf.mxu1 }
 0x1b6   : > { %v1538_v12 = vld [vmem:[%s1868_s4 + $0x18] sm:$0xff] }
 0x1b7   : > { %v735_v15 = vsel %vm692_vm5, %v686_v9, 0  ;;  %v754_v16 = vsel %vm692_vm5, %v687_v10, 0 }
 0x1b8   : > { %744 = vmatpush.bf16.xpose.msrb.mxu2 %v735_v15  ;;  %763 = vmatpush.bf16.xpose.msrb.mxu3 %v754_v16  ;;  %v1535_v15 = vld [vmem:[%s1868_s4] sm:$0xff]  ;;  %v1542_v16 = vld [vmem:[%s1868_s4 + $0x38] sm:$0xff] }
 0x1b9   : > { %1407 = vmatmul.msk.bf16.vlgmr.msrb.gmra.mxu0 %vm692_vm5, %v680_v13  ;;  %1408 = vmatmul.msk.bf16.vlgmr.msrb.gmra.mxu1 %vm692_vm5, %v681_v14  ;;  %v1537_v13 = vld [vmem:[%s1868_s4 + $0x10] sm:$0xff]  ;;  %v1536_v14 = vld [vmem:[%s1868_s4 + $0x8] sm:$0xff] }
 0x1bc   : > { %v553_v17 = vpop.f32.mrf.mxu2  ;;  %v578_v18 = vpop.f32.mrf.mxu3 }
 0x1bd   : > { %v601_v21 = vpop.f32.mrf.mxu0  ;;  %v626_v22 = vpop.f32.mrf.mxu1  ;;  %v1546_v17 = vld [vmem:[%s1868_s4 + $0x58] sm:$0xff]  ;;  %v1541_v18 = vld [vmem:[%s1868_s4 + $0x30] sm:$0xff] }
 0x1be   : > { %v688_v23 = vpack.c.bf16 %v601_v21, %v601_v21  ;;  %v689_v24 = vpack.c.bf16 %v626_v22, %v626_v22  ;;  %v1544_v21 = vld [vmem:[%s1868_s4 + $0x48] sm:$0xff]  ;;  %v1550_v22 = vld [vmem:[%s1868_s4 + $0x78] sm:$0xff] }
 0x1bf   : > { %1409 = vmatmul.msk.bf16.vlgmr.msrb.gmra.mxu2 %vm692_vm5, %v682_v19  ;;  %1410 = vmatmul.msk.bf16.vlgmr.msrb.gmra.mxu3 %vm692_vm5, %v683_v20  ;;  %v1545_v19 = vld [vmem:[%s1868_s4 + $0x50] sm:$0xff]  ;;  %v1540_v20 = vld [vmem:[%s1868_s4 + $0x28] sm:$0xff] }
 0x1c0   : > { %v815_v25 = vsel %vm813_vm6, %v688_v23, 0  ;;  %v834_v26 = vsel %vm813_vm6, %v689_v24, 0  ;;  %v1539_v23 = vld [vmem:[%s1868_s4 + $0x20] sm:$0xff] }
 0x1c1   : > { %824 = vmatpush.bf16.msra.mxu0 %v815_v25  ;;  %843 = vmatpush.bf16.msra.mxu1 %v834_v26  ;;  %v1543_v24 = vld [vmem:[%s1868_s4 + $0x40] sm:$0xff]  ;;  %v1549_v25 = vld [vmem:[%s1868_s4 + $0x70] sm:$0xff] }
 0x1c4   : > { %v651_v27 = vpop.f32.mrf.mxu2  ;;  %v676_v28 = vpop.f32.mrf.mxu3 }
 0x1c5   : > { %v690_v29 = vpack.c.bf16 %v651_v27, %v651_v27  ;;  %v691_v30 = vpack.c.bf16 %v676_v28, %v676_v28  ;;  %v603_v31 = vpop.f32.mrf.mxu0  ;;  %v628_v32 = vpop.f32.mrf.mxu1  ;;  %962 = vmatpush.bf16.msrb.mxu0 %v1538_v12  ;;  %1002 = vmatpush.bf16.msrb.mxu1 %v1542_v16  ;;  %v1548_v27 = vld [vmem:[%s1868_s4 + $0x68] sm:$0xff]  ;;  %v1547_v28 = vld [vmem:[%s1868_s4 + $0x60] sm:$0xff] }
 0x1c7   : > { %v853_v33 = vsel %vm813_vm6, %v690_v29, 0  ;;  %v872_v34 = vsel %vm813_vm6, %v691_v30, 0 }
 0x1c8   : > { %862 = vmatpush.bf16.msra.mxu2 %v853_v33  ;;  %881 = vmatpush.bf16.msra.mxu3 %v872_v34 }
 0x1c9   : > { %963 = vmatpush.bf16.msrb.mxu0 %v1537_v13  ;;  %1003 = vmatpush.bf16.msrb.mxu1 %v1541_v18 }
 0x1cc   : > { %v653_v35 = vpop.f32.mrf.mxu2  ;;  %v678_v36 = vpop.f32.mrf.mxu3  ;;  %1042 = vmatpush.bf16.msrb.mxu2 %v1546_v17  ;;  %1082 = vmatpush.bf16.msrb.mxu3 %v1550_v22 }
 0x1cd   : > { %964 = vmatpush.bf16.msrb.mxu0 %v1536_v14  ;;  %1004 = vmatpush.bf16.msrb.mxu1 %v1540_v20 }
 0x1d0   : > { %1043 = vmatpush.bf16.msrb.mxu2 %v1545_v19  ;;  %1083 = vmatpush.bf16.msrb.mxu3 %v1549_v25  ;;  %v1123_v25 = vperm.slane %v1722_v37, 3 }
 0x1d1   : > { %965 = vmatpush.bf16.msrb.mxu0 %v1535_v15  ;;  %1005 = vmatpush.bf16.msrb.mxu1 %v1539_v23  ;;  %v1552_v15 = vld [vmem:[%s1869_s5 + $0x8] sm:$0xff] }
 0x1d4   : > { %1044 = vmatpush.bf16.msrb.mxu2 %v1544_v21  ;;  %1084 = vmatpush.bf16.msrb.mxu3 %v1548_v27 }
 0x1d8   : > { %1045 = vmatpush.bf16.msrb.mxu2 %v1543_v24  ;;  %1085 = vmatpush.bf16.msrb.mxu3 %v1547_v28  ;;  %v1125_v28 = vperm.slane %v1722_v37, 4 }
 0x236   : > { %v708_v38 = vpop.f32.mrf.mxu0  ;;  %v727_v39 = vpop.f32.mrf.mxu1 }
 0x237   : > { %v770_v40 = vsel %vm769_vm7, %v708_v38, -inf  ;;  %v773_v43 = vsel %vm769_vm7, %v727_v39, -inf }
 0x238   : > { %771 = vmax.xlane.f32.xlu2 %v770_v40 }
 0x23e   : > { %v710_v41 = vpop.f32.mrf.mxu0  ;;  %v729_v42 = vpop.f32.mrf.mxu1 }
 0x240   : > { %774 = vmax.xlane.f32.xlu2 %v773_v43 }
 0x242   : > { %v746_v44 = vpop.f32.mrf.mxu2  ;;  %v765_v45 = vpop.f32.mrf.mxu3 }
 0x243   : > { %v776_v46 = vsel %vm769_vm7, %v746_v44, -inf  ;;  %v779_v49 = vsel %vm769_vm7, %v765_v45, -inf }
 0x244   : > { %777 = vmax.xlane.f32.xlu1 %v776_v46 }
 0x24a   : > { %v748_v47 = vpop.f32.mrf.mxu2  ;;  %v767_v48 = vpop.f32.mrf.mxu3 }
 0x24c   : > { %780 = vmax.xlane.f32.xlu1 %v779_v49 }
 0x2ab   : > { %v772_v50 = vpop.xlane.xlu2 %771 }
 0x2ac   : > { %v782_v51 = vsub.f32 %v708_v38, %v772_v50 }
 0x2ae   : > { %v786_v52 = vmul.f32 1.442695, %v782_v51 }
 0x2b0   : > { %1584 = vpow2.f32 %v786_v52 }
 0x2b3   : > { %v775_v53 = vpop.xlane.xlu2 %774 }
 0x2b4   : > { %v783_v54 = vsub.f32 %v727_v39, %v775_v53 }
 0x2b6   : > { %v1585_v55 = vpop.eup %1584  ;;  %v788_v56 = vmul.f32 1.442695, %v783_v54 }
 0x2b7   : > { %v806_v57 = vpack.c.bf16 %v1585_v55, %v1585_v55  ;;  %v778_v58 = vpop.xlane.xlu1 %777  ;;  %v794_v59 = vsel %vm769_vm7, %v1585_v55, 0.0 }
 0x2b8   : > { %1586 = vpow2.f32 %v788_v56  ;;  %v784_v60 = vsub.f32 %v746_v44, %v778_v58  ;;  %795 = vadd.xlane.f32.xlu2 %v794_v59 }
 0x2b9   : > { %1411 = vmatmul.msk.bf16.vlgmr.msra.gmra.mxu0 %vm769_vm7, %v806_v57 }
 0x2ba   : > { %v790_v61 = vmul.f32 1.442695, %v784_v60  ;;  %1157 = vmatpush.bf16.msra.mxu0 %v1552_v15 }
 0x2bc   : > { %1588 = vpow2.f32 %v790_v61 }
 0x2be   : > { %v1587_v62 = vpop.eup %1586 }
 0x2bf   : > { %v807_v63 = vpack.c.bf16 %v1587_v62, %v1587_v62  ;;  %v781_v1 = vpop.xlane.xlu1 %780  ;;  %v797_v11 = vsel %vm769_vm7, %v1587_v62, 0.0 }
 0x2c0   : > { %v785_v2 = vsub.f32 %v765_v45, %v781_v1 }
 0x2c1   : > { %1412 = vmatmul.msk.bf16.vlgmr.msra.gmra.mxu1 %vm769_vm7, %v807_v63 }
 0x2c2   : > { %v1589_v3 = vpop.eup %1588  ;;  %v792_v4 = vmul.f32 1.442695, %v785_v2  ;;  %v1098_v2 = vperm.slane %v1722_v37, 2 }
 0x2c3   : > { %v808_v5 = vpack.c.bf16 %v1589_v3, %v1589_v3  ;;  %v800_v6 = vsel %vm769_vm7, %v1589_v3, 0.0 }
 0x2c4   : > { %1590 = vpow2.f32 %v792_v4  ;;  %801 = vadd.xlane.f32.xlu0 %v800_v6 }
 0x2c5   : > { %1413 = vmatmul.msk.bf16.vlgmr.msra.gmra.mxu2 %vm769_vm7, %v808_v5 }
 0x2ca   : > { %v1591_v7 = vpop.eup %1590 }
 0x2cb   : > { %v809_v9 = vpack.c.bf16 %v1591_v7, %v1591_v7  ;;  %v803_v10 = vsel %vm769_vm7, %v1591_v7, 0.0 }
 0x2cc   : > { %804 = vadd.xlane.f32.xlu1 %v803_v10  ;;  %798 = vadd.xlane.f32.xlu0 %v797_v11 }
 0x2cd   : > { %1414 = vmatmul.msk.bf16.vlgmr.msra.gmra.mxu3 %vm769_vm7, %v809_v9 }
 0x32b   : > { %v796_v26 = vpop.xlane.xlu2 %795 }
 0x32c   : > { %1592 = vrcp.f32 %v796_v26 }
 0x332   : > { %v1593_v29 = vpop.eup %1592 }
 0x336   : > { %v826_v30 = vpop.f32.mrf.mxu0 }
 0x337   : > { %v891_v31 = vmul.f32 %v1593_v29, %v826_v30  ;;  %v802_v32 = vpop.xlane.xlu0 %801 }
 0x339   : > { %v895_v33 = vpack.c.bf16 %v891_v31, %v891_v31  ;;  %v1556_v31 = vld [vmem:[%s1870_s6 + $0x18] sm:$0xff] }
 0x33a   : > { %1214 = vmatpush.bf16.msra.mxu1 %v1556_v31 }
 0x33b   : > { %1431 = vmatmul.msk.bf16.vlgmr.msrb.gmra.mxu0 %vm692_vm5, %v895_v33  ;;  %v1554_v33 = vld [vmem:[%s1870_s6 + $0x8] sm:$0xff] }
 0x33e   : > { %v828_v34 = vpop.f32.mrf.mxu0  ;;  %v845_v35 = vpop.f32.mrf.mxu1 }
 0x33f   : > { %v799_v36 = vpop.xlane.xlu0 %798  ;;  %v805_v40 = vpop.xlane.xlu1 %804  ;;  %v1553_v34 = vld [vmem:[%s1870_s6] sm:$0xff] }
 0x340   : > { %1594 = vrcp.f32 %v799_v36 }
 0x341   : > { %1596 = vrcp.f32 %v802_v32  ;;  %v1555_v32 = vld [vmem:[%s1870_s6 + $0x10] sm:$0xff] }
 0x342   : > { %1598 = vrcp.f32 %v805_v40  ;;  %1215 = vmatpush.bf16.msra.mxu1 %v1555_v32 }
 0x346   : > { %v847_v38 = vpop.f32.mrf.mxu1  ;;  %v1595_v39 = vpop.eup %1594  ;;  %1216 = vmatpush.bf16.msra.mxu1 %v1554_v33 }
 0x347   : > { %v1597_v41 = vpop.eup %1596  ;;  %v892_v42 = vmul.f32 %v1595_v39, %v845_v35  ;;  %v1579_v35 = vld [vmem:[%s1866_s2] ss:$0 sm:$0xff] }
 0x348   : > { %v864_v43 = vpop.f32.mrf.mxu2  ;;  %v1599_v47 = vpop.eup %1598 }
 0x349   : > { %v893_v44 = vmul.f32 %v1597_v41, %v864_v43  ;;  %v896_v45 = vpack.c.bf16 %v892_v42, %v892_v42 }
 0x34a   : > { %1217 = vmatpush.bf16.msra.mxu1 %v1553_v34 }
 0x34b   : > { %v897_v46 = vpack.c.bf16 %v893_v44, %v893_v44  ;;  %1448 = vmatmul.msk.bf16.vlgmr.msrb.gmra.mxu1 %vm692_vm5, %v896_v45 }
 0x34d   : > { %1465 = vmatmul.msk.bf16.vlgmr.msrb.gmra.mxu2 %vm692_vm5, %v897_v46 }
 0x350   : > { %v866_v48 = vpop.f32.mrf.mxu2  ;;  %v883_v49 = vpop.f32.mrf.mxu3 }
 0x351   : > { %v894_v50 = vmul.f32 %v1599_v47, %v883_v49 }
 0x353   : > { %v898_v51 = vpack.c.bf16 %v894_v50, %v894_v50  ;;  %v1182_v50 = vperm.slane %v1722_v37, 5 }
 0x355   : > { %1482 = vmatmul.msk.bf16.vlgmr.msrb.gmra.mxu3 %vm692_vm5, %v898_v51 }
 0x358   : > { %v885_v52 = vpop.f32.mrf.mxu3 }
 0x3b8   : > { %v967_v53 = vpop.f32.mrf.mxu0 }
 0x3b9   : > { %v1091_v59 = vsel %vm294_vm0, %v967_v53, 0.0 }
 0x3c0   : > { %v969_v54 = vpop.f32.mrf.mxu0 }
 0x3c8   : > { %v1007_v55 = vpop.f32.mrf.mxu1 }
 0x3c9   : > { %v1092_v58 = vsel %vm294_vm0, %v1007_v55, 0.0 }
 0x3ca   : > { %v1093_v61 = vadd.f32 %v1092_v58, %v1091_v59 }
 0x3d0   : > { %v1047_v56 = vpop.f32.mrf.mxu2  ;;  %v1009_v57 = vpop.f32.mrf.mxu1 }
 0x3d1   : > { %v1094_v60 = vsel %vm294_vm0, %v1047_v56, 0.0 }
 0x3d2   : > { %v1095_v62 = vadd.f32 %v1094_v60, %v1093_v61 }
 0x3d8   : > { %v1049_v63 = vpop.f32.mrf.mxu2  ;;  %v1087_v1 = vpop.f32.mrf.mxu3 }
 0x3d9   : > { %v1096_v3 = vsel %vm294_vm0, %v1087_v1, 0.0 }
 0x3da   : > { %v1097_v4 = vadd.f32 %v1096_v3, %v1095_v62 }
 0x3dc   : > { %v1099_v5 = vadd.f32 %v1098_v2, %v1097_v4 }
 0x3de   : > { %v1820_v6 = vadd.f32 %v1099_v5, %v1709_v0  ;;  %v1551_v0 = vld [vmem:[%s1869_s5] sm:$0xff] }
 0x3df   : > { %1158 = vmatpush.bf16.msra.mxu0 %v1551_v0 }
 0x3e0   : > { %v1089_v7 = vpop.f32.mrf.mxu3  ;;  %v1101_v9 = vsel %vm294_vm0, %v1820_v6, 0.0 }
 0x3e1   : > { %1102 = vadd.xlane.f32.xlu1 %v1101_v9 }
 0x454   : > { %v1103_v10 = vpop.xlane.xlu1 %1102 }
 0x455   : > { %v1104_v11 = vmul.f32 %v1103_v10, %v1713_v8 }
 0x457   : > { %v1105_v12 = vsub.f32 %v1820_v6, %v1104_v11 }
 0x459   : > { %v1106_v13 = vmul.f32 %v1105_v12, %v1105_v12 }
 0x45b   : > { %v1107_v14 = vsel %vm294_vm0, %v1106_v13, 0.0 }
 0x45c   : > { %1108 = vadd.xlane.f32.xlu2 %v1107_v14 }
 0x4cf   : > { %v1109_v16 = vpop.xlane.xlu2 %1108 }
 0x4d0   : > { %v1110_v17 = vmul.f32 %v1109_v16, %v1713_v8 }
 0x4d2   : > { %v1111_v18 = vadd.f32 1e-05, %v1110_v17 }
 0x4d4   : > { %1600 = vrsqrt.f32 %v1111_v18  ;;  %vm1118_vm9 = vweird.f32 %v1111_v18 }
 0x4da   : > { %v1601_v19 = vpop.eup %1600 }
 0x4db   : > { %v1113_v20 = vmul.f32 %v1601_v19, %v1111_v18  ;;  %vm1119_vm8 = vweird.f32 %v1601_v19 }
 0x4dc   : > { %vm1120_vm10 = vmor %vm1118_vm9, %vm1119_vm8 }
 0x4dd   : > { %v1114_v21 = vmul.f32 %v1601_v19, %v1113_v20 }
 0x4df   : > { %v1115_v22 = vmul.f32 0.5, %v1114_v21 }
 0x4e1   : > { %v1116_v23 = vsub.f32 1.5, %v1115_v22 }
 0x4e3   : > { %v1117_v24 = vmul.f32 %v1601_v19, %v1116_v23 }
 0x4e5   : > { %v1121_v26 = vsel %vm1120_vm10, %v1601_v19, %v1117_v24 }
 0x4e6   : > { %v1122_v27 = vmul.f32 %v1121_v26, %v1105_v12 }
 0x4e8   : > { %v1124_v29 = vmul.f32 %v1123_v25, %v1122_v27 }
 0x4ea   : > { %v1126_v30 = vadd.f32 %v1125_v28, %v1124_v29 }
 0x4ec   : > { %v1127_v8 = vpack.c.bf16 %v1126_v30, %v1126_v30 }
 0x4ee   : > { %1491 = vmatmul.msk.bf16.vlgmr.msra.gmra.mxu0 %vm294_vm0, %v1127_v8 }
 0x56b   : > { %v1160_v36 = vpop.f32.mrf.mxu0 }
 0x56c   : > { %v1161_v38 = vadd.f32 %v1579_v35, %v1160_v36 }
 0x56e   : > { %v1165_v39 = vmul.f32 %v1161_v38, %v1161_v38  ;;  %v1164_v46 = vmul.f32 0.5, %v1161_v38 }
 0x570   : > { %v1166_v40 = vmul.f32 %v1165_v39, %v1161_v38 }
 0x572   : > { %v1167_v41 = vmul.f32 0.044715, %v1166_v40 }
 0x573   : > { %v1162_v42 = vpop.f32.mrf.mxu0 }
 0x574   : > { %v1168_v43 = vadd.f32 %v1167_v41, %v1161_v38 }
 0x576   : > { %v1169_v44 = vmul.f32 0.7978846, %v1168_v43 }
 0x578   : > { %1602 = vtanh.f32 %v1169_v44 }
 0x57e   : > { %v1603_v45 = vpop.eup %1602 }
 0x57f   : > { %v1171_v47 = vadd.f32 1.0, %v1603_v45 }
 0x581   : > { %v1172_v48 = vmul.f32 %v1171_v47, %v1164_v46 }
 0x583   : > { %v1173_v49 = vpack.c.bf16 %v1172_v48, %v1172_v48 }
 0x585   : > { %1508 = vmatmul.msk.bf16.vlgmr.msra.gmra.mxu1 %vm692_vm5, %v1173_v49 }
 0x602   : > { %v1219_v51 = vpop.f32.mrf.mxu1 }
 0x603   : > { %v1220_v52 = vadd.f32 %v1219_v51, %v1182_v50 }
 0x605   : > { %v1223_v53 = vadd.f32 %v1220_v52, %v1820_v6 }
 0x607   : > { %1224 = vst.msk [vmem:[%s290_s25] sm:$0xff] %vm294_vm0, %v1223_v53 }
 0x60a   : > { %v1221_v54 = vpop.f32.mrf.mxu1 }
 0x60b PF: > { %s18_s24 = sadd.s32 1, %s1644_s24  }
 0x60c   : > { %p15_p7 = scmp.ge.s32.totalorder %s18_s24, 4  }
 0x60e   :  { %17 = sbr.rel (!%p15_p7) target bundleno = 1 (0x1), region = 83 }
 0x613   :  { %1244 = vsyncpa [#allocation3], 1 }
 0x614   :  { %1246 = vsyncpa [#allocation3 + $0x1], 1 }

// kernel: transformer_forward.3
= control target key start
LH: loop header
LB: loop body
LE: loop exit
PB: predicated region body
PF: predicated region fallthrough
CT: control target
= control target key end

     0   :  { %12 = vsyncpa [#allocation3], 0  ;;  %s2023_s0 = inlined_call_operand.vmem [shape: f32[2,8,32], index: 0, kind: input, shape index: {}]   ;;  %s2024_s1 = inlined_call_operand.vmem [shape: f32[6,32], index: 1, kind: input, shape index: {}]   ;;  %s2025_s2 = inlined_call_operand.vmem [shape: f32[1,64], index: 2, kind: input, shape index: {}]   ;;  %s2026_s3 = inlined_call_operand.vmem [shape: bf16[12,32,64], index: 3, kind: input, shape index: {}]   ;;  %s2027_s4 = inlined_call_operand.vmem [shape: bf16[4,64,32], index: 4, kind: input, shape index: {}]   ;;  %s2028_s5 = inlined_call_operand.vmem [shape: bf16[32,64], index: 5, kind: input, shape index: {}]   ;;  %s2029_s6 = inlined_call_operand.vmem [shape: bf16[64,32], index: 6, kind: input, shape index: {}]   ;;  %s2030_s7 = inlined_call_operand.hbm [shape: f32[2,8,32], index: 7, kind: output, shape index: {}]  }
   0x1   :  { %14 = vsyncpa [#allocation3 + $0x1], 0  ;;  %s1719_s24 = smov 0   ;;  %s1721_s25 = smov 0  }
   0x2   :  { %s1723_s26 = smov 0   ;;  %s1725_s27 = smov 0  }
   0x3 LB: > { %s1740_s28 = sadd.s32 4294967295, %s1676_s27   ;;  %s1283_s29 = sadd.s32 4294967294, %s1676_s27   ;;  %s1676_s27 = sphi %s1725_s27, %s2036_s27   ;;  %s1672_s26 = sphi %s1723_s26, %s2035_s26   ;;  %s1668_s25 = sphi %s1721_s25, %s2034_s25   ;;  %s1664_s24 = sphi %s1719_s24, %s2033_s24  }
   0x4   : > { %s1744_s30 = sadd.s32 1, %s1676_s27   ;;  %s179_s8 = sadd.s32 1, %s1672_s26 }
   0x5   : > { %s176_s9 = ssub.s32 %s1676_s27, %s1744_s30  ;;  %p189_p0 = scmp.ne.s32.totalorder %s1672_s26, %s1668_s25 }
   0x6   : > { %p177_p1 = scmp.eq.s32.totalorder %s176_s9, 0  ;;  %p190_p2 = scmp.eq.s32.totalorder %s1740_s28, 1 }
   0x7   : > { %p195_p3 = scmp.ne.s32.totalorder %s1668_s25, %s1664_s24  ;;  %p196_p4 = scmp.eq.s32.totalorder %s1283_s29, 1 }
   0x8   : > { %s1755_s10 = scalar_select %p177_p1, %s1672_s26, %s179_s8  }
   0x9   : > { %p1757_p5 = por %p190_p2, %p189_p0  ;;  %p1761_p6 = por %p196_p4, %p195_p3 }
   0xa   : > { %p1286_p7 = scmp.ge.s32.totalorder %s1676_s27, 1  ;;  %p239_p8 = scmp.lt.s32.totalorder %s1676_s27, 3 }
   0xc   : > { %p240_p9 = pnand %p1286_p7, %p239_p8 }
   0xd   : > { %p270_p10 = scmp.lt.s32.totalorder (!%p240_p9), %s1740_s28, 1  ;;  %s267_s16 = sand.u32 (!%p240_p9), 1, %s1668_s25  }
   0xe   : > { %243 = sbr.rel (%p240_p9) target bundleno = 1553 (0x611), region = 48  ;;  %s1500_s18 = sshll.u32 (!%p240_p9), %s1740_s28, 3 }
   0xf   : > { %s1219_s21 = scalar_lea.hbm (!%p240_p9), %s2030_s7, %s1500_s18  ;;  %s1209_s8 = scalar_lea.sflag (!%p240_p9), [#allocation3], %s267_s16 }
  0x10   : > { %s1223_s29 = sshll.u32 (!%p240_p9), %s1219_s21, 4  ;;  %s1634_s15 = scalar_lea.hbm (!%p240_p9), %s2030_s7, 16  ;;  %s1224_s29 = int_to_ptr.hbm [resolvable:$true] %s1223_s29 }
  0x13   : > { %s271_s13 = scalar_select %p270_p10, %s1740_s28, 1  ;;  %vm277_vm0 = vcmask 261120   ;;  %v1678_v2 = vmov 32.0   ;;  %v1504_v14 = vld [vmem:[%s2026_s3 + $0x8] sm:$0xff]  ;;  %v1506_v15 = vld [vmem:[%s2026_s3 + $0x18] sm:$0xff]  ;;  %v1503_v18 = vld [vmem:[%s2026_s3] sm:$0xff] }
  0x14   : > { %1590 = vrcp.f32 %v1678_v2  ;;  %v1508_v16 = vld [vmem:[%s2026_s3 + $0x28] sm:$0xff]  ;;  %v1510_v17 = vld [vmem:[%s2026_s3 + $0x38] sm:$0xff]  ;;  %381 = vmatpush.bf16.msra.mxu0 %v1504_v14  ;;  %406 = vmatpush.bf16.msra.mxu1 %v1506_v15  ;;  %v1505_v19 = vld [vmem:[%s2026_s3 + $0x10] sm:$0xff]  ;;  %vm675_vm5 = vcmask 523264   ;;  %vm796_vm6 = vcmask 1043456   ;;  %vm752_vm7 = vcmask 64512  }
  0x15   : > { %s1288_s14 = sshll.u32 %s271_s13, 3  ;;  %431 = vmatpush.bf16.msra.mxu2 %v1508_v16  ;;  %456 = vmatpush.bf16.msra.mxu3 %v1510_v17  ;;  %v1507_v20 = vld [vmem:[%s2026_s3 + $0x20] sm:$0xff]  ;;  %v1509_v21 = vld [vmem:[%s2026_s3 + $0x30] sm:$0xff]  ;;  %v1512_v23 = vld [vmem:[%s2026_s3 + $0x48] sm:$0xff]  ;;  %s1628_s28 = sshra.s32 %s1224_s29, 4  ;;  %s1629_s28 = int_to_ptr.hbm [resolvable:$true] %s1628_s28 }
  0x16   : > { %s273_s17 = scalar_lea.vmem %s2023_s0, %s1288_s14  ;;  %v1514_v24 = vld [vmem:[%s2026_s3 + $0x58] sm:$0xff]  ;;  %v1516_v25 = vld [vmem:[%s2026_s3 + $0x68] sm:$0xff]  ;;  %v1511_v28 = vld [vmem:[%s2026_s3 + $0x40] sm:$0xff]  ;;  %s1630_s9 = scalar_lea.hbm %s1629_s28, 8 }
  0x17   : > { %v1772_v0 = vld [vmem:[%s273_s17] sm:$0xff]  ;;  %v1518_v27 = vld [vmem:[%s2026_s3 + $0x78] sm:$0xff]  ;;  %v1513_v29 = vld [vmem:[%s2026_s3 + $0x50] sm:$0xff]  ;;  %s1287_s17 = sshll.u32 %s267_s16, 3  ;;  %p1631_p11 = scmp.ne.s32.totalorder %s1629_s28, %s1630_s9 }
  0x18   : > { %v278_v1 = vsel %vm277_vm0, %v1772_v0, 0.0  ;;  %382 = vmatpush.bf16.msra.mxu0 %v1503_v18  ;;  %407 = vmatpush.bf16.msra.mxu1 %v1505_v19  ;;  %v1515_v31 = vld [vmem:[%s2026_s3 + $0x60] sm:$0xff]  ;;  %v1517_v32 = vld [vmem:[%s2026_s3 + $0x70] sm:$0xff]  ;;  %v1520_v47 = vld [vmem:[%s2026_s3 + $0x88] sm:$0xff]  ;;  %s269_s22 = scalar_lea.vmem [#allocation2], %s1287_s17  ;;  %p1635_p0 = scmp.lt.s32.totalorder %s1629_s28, %s2030_s7 }
  0x19   : > { %279 = vadd.xlane.f32.xlu0 %v278_v1  ;;  %432 = vmatpush.bf16.msra.mxu2 %v1507_v20  ;;  %v1833_v37 = vld [vmem:[%s2024_s1] sm:$0x3f]  ;;  %v1522_v48 = vld [vmem:[%s2026_s3 + $0x98] sm:$0xff]  ;;  %v1524_v49 = vld [vmem:[%s2026_s3 + $0xa8] sm:$0xff]  ;;  %s1221_s23 = sshll.u32 %s269_s22, 4  ;;  %p1632_p12 = pnand %p1631_p11, %p1757_p5  ;;  %s1222_s23 = int_to_ptr.vmem [resolvable:$true] %s1221_s23 }
  0x1a   : > { %v1591_v3 = vpop.eup %1590  ;;  %457 = vmatpush.bf16.msra.mxu3 %v1509_v21  ;;  %v307_v40 = vperm.slane %v1833_v37, 0  ;;  %v309_v42 = vperm.slane %v1833_v37, 1  ;;  %v1526_v50 = vld [vmem:[%s2026_s3 + $0xb8] sm:$0xff]  ;;  %v1519_v51 = vld [vmem:[%s2026_s3 + $0x80] sm:$0xff]  ;;  %v1521_v52 = vld [vmem:[%s2026_s3 + $0x90] sm:$0xff]  ;;  %p1636_p1 = scmp.lt.s32.totalorder %s1634_s15, %s1630_s9 }
  0x1b   : > { %v282_v4 = vmul.f32 32.0, %v1591_v3  ;;  %vm286_vm1 = vweird.f32 %v1591_v3  ;;  %v1523_v53 = vld [vmem:[%s2026_s3 + $0xa0] sm:$0xff]  ;;  %v1525_v54 = vld [vmem:[%s2026_s3 + $0xb0] sm:$0xff]  ;;  %p1633_p13 = pneg %p1632_p12 }
  0x1c   : > { %481 = vmatpush.bf16.msrb.mxu0 %v1512_v23  ;;  %506 = vmatpush.bf16.msrb.mxu1 %v1514_v24  ;;  %p1637_p2 = por %p1636_p1, %p1635_p0 }
  0x1d   : > { %v283_v5 = vsub.f32 1.0, %v282_v4  ;;  %531 = vmatpush.bf16.msrb.mxu2 %v1516_v25 }
  0x1e   : > { %556 = vmatpush.bf16.msrb.mxu3 %v1518_v27  ;;  %p1638_p3 = pnand %p1637_p2, %p1633_p13 }
  0x1f   : > { %v284_v6 = vmul.f32 %v1591_v3, %v283_v5 }
  0x20   : > { %482 = vmatpush.bf16.msrb.mxu0 %v1511_v28  ;;  %507 = vmatpush.bf16.msrb.mxu1 %v1513_v29 }
  0x21   : > { %v285_v7 = vadd.f32 %v1591_v3, %v284_v6  ;;  %532 = vmatpush.bf16.msrb.mxu2 %v1515_v31 }
  0x22   : > { %557 = vmatpush.bf16.msrb.mxu3 %v1517_v32 }
  0x23   : > { %v1776_v8 = vsel %vm286_vm1, %v1591_v3, %v285_v7 }
  0x8c   : > { %v280_v9 = vpop.xlane.xlu0 %279 }
  0x8d   : > { %v288_v10 = vmul.f32 %v1776_v8, %v280_v9 }
  0x8f   : > { %v289_v11 = vsub.f32 %v1772_v0, %v288_v10 }
  0x91   : > { %v290_v12 = vmul.f32 %v289_v11, %v289_v11 }
  0x93   : > { %v291_v13 = vsel %vm277_vm0, %v290_v12, 0.0 }
  0x94   : > { %292 = vadd.xlane.f32.xlu0 %v291_v13 }
 0x107   : > { %v293_v22 = vpop.xlane.xlu0 %292 }
 0x108   : > { %v294_v26 = vmul.f32 %v293_v22, %v1776_v8 }
 0x10a   : > { %v295_v30 = vadd.f32 1e-05, %v294_v26 }
 0x10c   : > { %1592 = vrsqrt.f32 %v295_v30  ;;  %vm302_vm3 = vweird.f32 %v295_v30 }
 0x112   : > { %v1593_v33 = vpop.eup %1592 }
 0x113   : > { %v297_v34 = vmul.f32 %v1593_v33, %v295_v30  ;;  %vm303_vm2 = vweird.f32 %v1593_v33 }
 0x114   : > { %vm304_vm4 = vmor %vm302_vm3, %vm303_vm2 }
 0x115   : > { %v298_v35 = vmul.f32 %v1593_v33, %v297_v34 }
 0x117   : > { %v299_v36 = vmul.f32 0.5, %v298_v35 }
 0x119   : > { %v300_v38 = vsub.f32 1.5, %v299_v36 }
 0x11b   : > { %v301_v39 = vmul.f32 %v1593_v33, %v300_v38 }
 0x11d   : > { %v305_v41 = vsel %vm304_vm4, %v1593_v33, %v301_v39 }
 0x11e   : > { %v306_v43 = vmul.f32 %v305_v41, %v289_v11 }
 0x120   : > { %v308_v44 = vmul.f32 %v307_v40, %v306_v43 }
 0x122   : > { %v310_v45 = vadd.f32 %v309_v42, %v308_v44 }
 0x124   : > { %v311_v46 = vpack.c.bf16 %v310_v45, %v310_v45 }
 0x126   : > { %1297 = vmatmul.msk.bf16.vlgmr.msra.gmra.mxu0 %vm277_vm0, %v311_v46  ;;  %1306 = vmatmul.msk.bf16.vlgmr.msra.gmra.mxu1 %vm277_vm0, %v311_v46 }
 0x127   : > { %1315 = vmatmul.msk.bf16.vlgmr.msra.gmra.mxu2 %vm277_vm0, %v311_v46  ;;  %1324 = vmatmul.msk.bf16.vlgmr.msra.gmra.mxu3 %vm277_vm0, %v311_v46 }
 0x128   : > { %581 = vmatpush.bf16.msra.mxu0 %v1520_v47  ;;  %606 = vmatpush.bf16.msra.mxu1 %v1522_v48 }
 0x129   : > { %631 = vmatpush.bf16.msra.mxu2 %v1524_v49  ;;  %656 = vmatpush.bf16.msra.mxu3 %v1526_v50 }
 0x12c   : > { %582 = vmatpush.bf16.msra.mxu0 %v1519_v51  ;;  %607 = vmatpush.bf16.msra.mxu1 %v1521_v52 }
 0x12d   : > { %632 = vmatpush.bf16.msra.mxu2 %v1523_v53  ;;  %657 = vmatpush.bf16.msra.mxu3 %v1525_v54 }
 0x136   : > { %1333 = vmatmul.msk.bf16.vlgmr.msrb.gmra.mxu0 %vm277_vm0, %v311_v46  ;;  %1342 = vmatmul.msk.bf16.vlgmr.msrb.gmra.mxu1 %vm277_vm0, %v311_v46 }
 0x137   : > { %1351 = vmatmul.msk.bf16.vlgmr.msrb.gmra.mxu2 %vm277_vm0, %v311_v46  ;;  %1360 = vmatmul.msk.bf16.vlgmr.msrb.gmra.mxu3 %vm277_vm0, %v311_v46 }
 0x146   : > { %1369 = vmatmul.msk.bf16.vlgmr.msra.gmra.mxu0 %vm277_vm0, %v311_v46  ;;  %1378 = vmatmul.msk.bf16.vlgmr.msra.gmra.mxu1 %vm277_vm0, %v311_v46 }
 0x147   : > { %1387 = vmatmul.msk.bf16.vlgmr.msra.gmra.mxu2 %vm277_vm0, %v311_v46  ;;  %1396 = vmatmul.msk.bf16.vlgmr.msra.gmra.mxu3 %vm277_vm0, %v311_v46 }
 0x1a3   : > { %v384_v55 = vpop.f32.mrf.mxu0  ;;  %v409_v56 = vpop.f32.mrf.mxu1 }
 0x1a4   : > { %v663_v13 = vpack.c.bf16 %v384_v55, %v384_v55  ;;  %v664_v14 = vpack.c.bf16 %v409_v56, %v409_v56 }
 0x1aa   : > { %v434_v57 = vpop.f32.mrf.mxu2  ;;  %v459_v58 = vpop.f32.mrf.mxu3 }
 0x1ab   : > { %v386_v59 = vpop.f32.mrf.mxu0  ;;  %v411_v60 = vpop.f32.mrf.mxu1  ;;  %v665_v19 = vpack.c.bf16 %v434_v57, %v434_v57  ;;  %v666_v20 = vpack.c.bf16 %v459_v58, %v459_v58 }
 0x1b2   : > { %v436_v61 = vpop.f32.mrf.mxu2  ;;  %v461_v62 = vpop.f32.mrf.mxu3 }
 0x1b3   : > { %v484_v63 = vpop.f32.mrf.mxu0  ;;  %v509_v1 = vpop.f32.mrf.mxu1 }
 0x1b4   : > { %v667_v2 = vpack.c.bf16 %v484_v63, %v484_v63  ;;  %v668_v3 = vpack.c.bf16 %v509_v1, %v509_v1 }
 0x1b6   : > { %v680_v4 = vsel %vm675_vm5, %v667_v2, 0  ;;  %v699_v5 = vsel %vm675_vm5, %v668_v3, 0 }
 0x1b7   : > { %689 = vmatpush.bf16.xpose.msrb.mxu0 %v680_v4  ;;  %708 = vmatpush.bf16.xpose.msrb.mxu1 %v699_v5 }
 0x1ba   : > { %v534_v6 = vpop.f32.mrf.mxu2  ;;  %v559_v7 = vpop.f32.mrf.mxu3 }
 0x1bb   : > { %v669_v9 = vpack.c.bf16 %v534_v6, %v534_v6  ;;  %v670_v10 = vpack.c.bf16 %v559_v7, %v559_v7  ;;  %v486_v11 = vpop.f32.mrf.mxu0  ;;  %v511_v12 = vpop.f32.mrf.mxu1 }
 0x1bc   : > { %v1530_v12 = vld [vmem:[%s2027_s4 + $0x18] sm:$0xff] }
 0x1bd   : > { %v718_v15 = vsel %vm675_vm5, %v669_v9, 0  ;;  %v737_v16 = vsel %vm675_vm5, %v670_v10, 0 }
 0x1be   : > { %727 = vmatpush.bf16.xpose.msrb.mxu2 %v718_v15  ;;  %746 = vmatpush.bf16.xpose.msrb.mxu3 %v737_v16  ;;  %v1527_v15 = vld [vmem:[%s2027_s4] sm:$0xff]  ;;  %v1534_v16 = vld [vmem:[%s2027_s4 + $0x38] sm:$0xff] }
 0x1bf   : > { %1397 = vmatmul.msk.bf16.vlgmr.msrb.gmra.mxu0 %vm675_vm5, %v663_v13  ;;  %1398 = vmatmul.msk.bf16.vlgmr.msrb.gmra.mxu1 %vm675_vm5, %v664_v14  ;;  %v1529_v13 = vld [vmem:[%s2027_s4 + $0x10] sm:$0xff]  ;;  %v1528_v14 = vld [vmem:[%s2027_s4 + $0x8] sm:$0xff] }
 0x1c2   : > { %v536_v17 = vpop.f32.mrf.mxu2  ;;  %v561_v18 = vpop.f32.mrf.mxu3 }
 0x1c3   : > { %v584_v21 = vpop.f32.mrf.mxu0  ;;  %v609_v22 = vpop.f32.mrf.mxu1  ;;  %v1538_v17 = vld [vmem:[%s2027_s4 + $0x58] sm:$0xff]  ;;  %v1533_v18 = vld [vmem:[%s2027_s4 + $0x30] sm:$0xff] }
 0x1c4   : > { %v671_v23 = vpack.c.bf16 %v584_v21, %v584_v21  ;;  %v672_v24 = vpack.c.bf16 %v609_v22, %v609_v22  ;;  %v1536_v21 = vld [vmem:[%s2027_s4 + $0x48] sm:$0xff]  ;;  %v1542_v22 = vld [vmem:[%s2027_s4 + $0x78] sm:$0xff] }
 0x1c5   : > { %1399 = vmatmul.msk.bf16.vlgmr.msrb.gmra.mxu2 %vm675_vm5, %v665_v19  ;;  %1400 = vmatmul.msk.bf16.vlgmr.msrb.gmra.mxu3 %vm675_vm5, %v666_v20  ;;  %v1537_v19 = vld [vmem:[%s2027_s4 + $0x50] sm:$0xff]  ;;  %v1532_v20 = vld [vmem:[%s2027_s4 + $0x28] sm:$0xff] }
 0x1c6   : > { %v798_v25 = vsel %vm796_vm6, %v671_v23, 0  ;;  %v817_v26 = vsel %vm796_vm6, %v672_v24, 0  ;;  %v1531_v23 = vld [vmem:[%s2027_s4 + $0x20] sm:$0xff] }
 0x1c7   : > { %807 = vmatpush.bf16.msra.mxu0 %v798_v25  ;;  %826 = vmatpush.bf16.msra.mxu1 %v817_v26  ;;  %v1535_v24 = vld [vmem:[%s2027_s4 + $0x40] sm:$0xff]  ;;  %v1541_v25 = vld [vmem:[%s2027_s4 + $0x70] sm:$0xff] }
 0x1ca   : > { %v634_v27 = vpop.f32.mrf.mxu2  ;;  %v659_v28 = vpop.f32.mrf.mxu3 }
 0x1cb   : > { %v673_v29 = vpack.c.bf16 %v634_v27, %v634_v27  ;;  %v674_v30 = vpack.c.bf16 %v659_v28, %v659_v28  ;;  %v586_v31 = vpop.f32.mrf.mxu0  ;;  %v611_v32 = vpop.f32.mrf.mxu1  ;;  %945 = vmatpush.bf16.msrb.mxu0 %v1530_v12  ;;  %985 = vmatpush.bf16.msrb.mxu1 %v1534_v16  ;;  %v1540_v27 = vld [vmem:[%s2027_s4 + $0x68] sm:$0xff]  ;;  %v1539_v28 = vld [vmem:[%s2027_s4 + $0x60] sm:$0xff] }
 0x1cd   : > { %v836_v33 = vsel %vm796_vm6, %v673_v29, 0  ;;  %v855_v34 = vsel %vm796_vm6, %v674_v30, 0 }
 0x1ce   : > { %845 = vmatpush.bf16.msra.mxu2 %v836_v33  ;;  %864 = vmatpush.bf16.msra.mxu3 %v855_v34 }
 0x1cf   : > { %946 = vmatpush.bf16.msrb.mxu0 %v1529_v13  ;;  %986 = vmatpush.bf16.msrb.mxu1 %v1533_v18 }
 0x1d2   : > { %v636_v35 = vpop.f32.mrf.mxu2  ;;  %v661_v36 = vpop.f32.mrf.mxu3  ;;  %1025 = vmatpush.bf16.msrb.mxu2 %v1538_v17  ;;  %1065 = vmatpush.bf16.msrb.mxu3 %v1542_v22 }
 0x1d3   : > { %947 = vmatpush.bf16.msrb.mxu0 %v1528_v14  ;;  %987 = vmatpush.bf16.msrb.mxu1 %v1532_v20 }
 0x1d6   : > { %1026 = vmatpush.bf16.msrb.mxu2 %v1537_v19  ;;  %1066 = vmatpush.bf16.msrb.mxu3 %v1541_v25  ;;  %v1106_v25 = vperm.slane %v1833_v37, 3 }
 0x1d7   : > { %948 = vmatpush.bf16.msrb.mxu0 %v1527_v15  ;;  %988 = vmatpush.bf16.msrb.mxu1 %v1531_v23  ;;  %v1544_v15 = vld [vmem:[%s2028_s5 + $0x8] sm:$0xff] }
 0x1da   : > { %1027 = vmatpush.bf16.msrb.mxu2 %v1536_v21  ;;  %1067 = vmatpush.bf16.msrb.mxu3 %v1540_v27 }
 0x1de   : > { %1028 = vmatpush.bf16.msrb.mxu2 %v1535_v24  ;;  %1068 = vmatpush.bf16.msrb.mxu3 %v1539_v28  ;;  %v1108_v28 = vperm.slane %v1833_v37, 4 }
 0x23c   : > { %v691_v38 = vpop.f32.mrf.mxu0  ;;  %v710_v39 = vpop.f32.mrf.mxu1 }
 0x23d   : > { %v753_v40 = vsel %vm752_vm7, %v691_v38, -inf  ;;  %v756_v43 = vsel %vm752_vm7, %v710_v39, -inf }
 0x23e   : > { %754 = vmax.xlane.f32.xlu2 %v753_v40 }
 0x244   : > { %v693_v41 = vpop.f32.mrf.mxu0  ;;  %v712_v42 = vpop.f32.mrf.mxu1 }
 0x246   : > { %757 = vmax.xlane.f32.xlu2 %v756_v43 }
 0x248   : > { %v729_v44 = vpop.f32.mrf.mxu2  ;;  %v748_v45 = vpop.f32.mrf.mxu3 }
 0x249   : > { %v759_v46 = vsel %vm752_vm7, %v729_v44, -inf  ;;  %v762_v49 = vsel %vm752_vm7, %v748_v45, -inf }
 0x24a   : > { %760 = vmax.xlane.f32.xlu1 %v759_v46 }
 0x250   : > { %v731_v47 = vpop.f32.mrf.mxu2  ;;  %v750_v48 = vpop.f32.mrf.mxu3 }
 0x252   : > { %763 = vmax.xlane.f32.xlu1 %v762_v49 }
 0x2b1   : > { %v755_v50 = vpop.xlane.xlu2 %754 }
 0x2b2   : > { %v765_v51 = vsub.f32 %v691_v38, %v755_v50 }
 0x2b4   : > { %v769_v52 = vmul.f32 1.442695, %v765_v51 }
 0x2b6   : > { %1594 = vpow2.f32 %v769_v52 }
 0x2b9   : > { %v758_v53 = vpop.xlane.xlu2 %757 }
 0x2ba   : > { %v766_v54 = vsub.f32 %v710_v39, %v758_v53 }
 0x2bc   : > { %v1595_v55 = vpop.eup %1594  ;;  %v771_v56 = vmul.f32 1.442695, %v766_v54 }
 0x2bd   : > { %v789_v57 = vpack.c.bf16 %v1595_v55, %v1595_v55  ;;  %v761_v58 = vpop.xlane.xlu1 %760  ;;  %v777_v59 = vsel %vm752_vm7, %v1595_v55, 0.0 }
 0x2be   : > { %1596 = vpow2.f32 %v771_v56  ;;  %v767_v60 = vsub.f32 %v729_v44, %v761_v58  ;;  %778 = vadd.xlane.f32.xlu2 %v777_v59 }
 0x2bf   : > { %1401 = vmatmul.msk.bf16.vlgmr.msra.gmra.mxu0 %vm752_vm7, %v789_v57 }
 0x2c0   : > { %v773_v61 = vmul.f32 1.442695, %v767_v60  ;;  %1140 = vmatpush.bf16.msra.mxu0 %v1544_v15 }
 0x2c2   : > { %1598 = vpow2.f32 %v773_v61 }
 0x2c4   : > { %v1597_v62 = vpop.eup %1596 }
 0x2c5   : > { %v790_v63 = vpack.c.bf16 %v1597_v62, %v1597_v62  ;;  %v764_v1 = vpop.xlane.xlu1 %763  ;;  %v780_v11 = vsel %vm752_vm7, %v1597_v62, 0.0 }
 0x2c6   : > { %v768_v2 = vsub.f32 %v748_v45, %v764_v1 }
 0x2c7   : > { %1402 = vmatmul.msk.bf16.vlgmr.msra.gmra.mxu1 %vm752_vm7, %v790_v63 }
 0x2c8   : > { %v1599_v3 = vpop.eup %1598  ;;  %v775_v4 = vmul.f32 1.442695, %v768_v2  ;;  %v1081_v2 = vperm.slane %v1833_v37, 2 }
 0x2c9   : > { %v791_v5 = vpack.c.bf16 %v1599_v3, %v1599_v3  ;;  %v783_v6 = vsel %vm752_vm7, %v1599_v3, 0.0 }
 0x2ca   : > { %1600 = vpow2.f32 %v775_v4  ;;  %784 = vadd.xlane.f32.xlu0 %v783_v6 }
 0x2cb   : > { %1403 = vmatmul.msk.bf16.vlgmr.msra.gmra.mxu2 %vm752_vm7, %v791_v5 }
 0x2d0   : > { %v1601_v7 = vpop.eup %1600 }
 0x2d1   : > { %v792_v9 = vpack.c.bf16 %v1601_v7, %v1601_v7  ;;  %v786_v10 = vsel %vm752_vm7, %v1601_v7, 0.0 }
 0x2d2   : > { %787 = vadd.xlane.f32.xlu1 %v786_v10  ;;  %781 = vadd.xlane.f32.xlu0 %v780_v11 }
 0x2d3   : > { %1404 = vmatmul.msk.bf16.vlgmr.msra.gmra.mxu3 %vm752_vm7, %v792_v9 }
 0x331   : > { %v779_v26 = vpop.xlane.xlu2 %778 }
 0x332   : > { %1602 = vrcp.f32 %v779_v26 }
 0x338   : > { %v1603_v29 = vpop.eup %1602 }
 0x33c   : > { %v809_v30 = vpop.f32.mrf.mxu0 }
 0x33d   : > { %v874_v31 = vmul.f32 %v1603_v29, %v809_v30  ;;  %v785_v32 = vpop.xlane.xlu0 %784 }
 0x33f   : > { %v878_v33 = vpack.c.bf16 %v874_v31, %v874_v31  ;;  %v1548_v31 = vld [vmem:[%s2029_s6 + $0x18] sm:$0xff] }
 0x340   : > { %1197 = vmatpush.bf16.msra.mxu1 %v1548_v31 }
 0x341   : > { %1421 = vmatmul.msk.bf16.vlgmr.msrb.gmra.mxu0 %vm675_vm5, %v878_v33  ;;  %v1546_v33 = vld [vmem:[%s2029_s6 + $0x8] sm:$0xff] }
 0x344   : > { %v811_v34 = vpop.f32.mrf.mxu0  ;;  %v828_v35 = vpop.f32.mrf.mxu1 }
 0x345   : > { %v782_v36 = vpop.xlane.xlu0 %781  ;;  %v788_v40 = vpop.xlane.xlu1 %787  ;;  %v1545_v34 = vld [vmem:[%s2029_s6] sm:$0xff] }
 0x346   : > { %1604 = vrcp.f32 %v782_v36 }
 0x347   : > { %1606 = vrcp.f32 %v785_v32  ;;  %v1547_v32 = vld [vmem:[%s2029_s6 + $0x10] sm:$0xff] }
 0x348   : > { %1608 = vrcp.f32 %v788_v40  ;;  %1198 = vmatpush.bf16.msra.mxu1 %v1547_v32 }
 0x34c   : > { %v830_v38 = vpop.f32.mrf.mxu1  ;;  %v1605_v39 = vpop.eup %1604  ;;  %1199 = vmatpush.bf16.msra.mxu1 %v1546_v33 }
 0x34d   : > { %v1607_v41 = vpop.eup %1606  ;;  %v875_v42 = vmul.f32 %v1605_v39, %v828_v35  ;;  %v1589_v35 = vld [vmem:[%s2025_s2] ss:$0 sm:$0xff] }
 0x34e   : > { %v847_v43 = vpop.f32.mrf.mxu2  ;;  %v1609_v47 = vpop.eup %1608 }
 0x34f   : > { %v876_v44 = vmul.f32 %v1607_v41, %v847_v43  ;;  %v879_v45 = vpack.c.bf16 %v875_v42, %v875_v42 }
 0x350   : > { %1200 = vmatpush.bf16.msra.mxu1 %v1545_v34 }
 0x351   : > { %v880_v46 = vpack.c.bf16 %v876_v44, %v876_v44  ;;  %1438 = vmatmul.msk.bf16.vlgmr.msrb.gmra.mxu1 %vm675_vm5, %v879_v45 }
 0x353   : > { %1455 = vmatmul.msk.bf16.vlgmr.msrb.gmra.mxu2 %vm675_vm5, %v880_v46 }
 0x356   : > { %v849_v48 = vpop.f32.mrf.mxu2  ;;  %v866_v49 = vpop.f32.mrf.mxu3 }
 0x357   : > { %v877_v50 = vmul.f32 %v1609_v47, %v866_v49 }
 0x359   : > { %v881_v51 = vpack.c.bf16 %v877_v50, %v877_v50  ;;  %v1165_v50 = vperm.slane %v1833_v37, 5 }
 0x35b   : > { %1472 = vmatmul.msk.bf16.vlgmr.msrb.gmra.mxu3 %vm675_vm5, %v881_v51 }
 0x35e   : > { %v868_v52 = vpop.f32.mrf.mxu3 }
 0x3be   : > { %v950_v53 = vpop.f32.mrf.mxu0 }
 0x3bf   : > { %v1074_v59 = vsel %vm277_vm0, %v950_v53, 0.0 }
 0x3c6   : > { %v952_v54 = vpop.f32.mrf.mxu0 }
 0x3ce   : > { %v990_v55 = vpop.f32.mrf.mxu1 }
 0x3cf   : > { %v1075_v58 = vsel %vm277_vm0, %v990_v55, 0.0 }
 0x3d0   : > { %v1076_v61 = vadd.f32 %v1075_v58, %v1074_v59 }
 0x3d6   : > { %v1030_v56 = vpop.f32.mrf.mxu2  ;;  %v992_v57 = vpop.f32.mrf.mxu1 }
 0x3d7   : > { %v1077_v60 = vsel %vm277_vm0, %v1030_v56, 0.0 }
 0x3d8   : > { %v1078_v62 = vadd.f32 %v1077_v60, %v1076_v61 }
 0x3de   : > { %v1032_v63 = vpop.f32.mrf.mxu2  ;;  %v1070_v1 = vpop.f32.mrf.mxu3 }
 0x3df   : > { %v1079_v3 = vsel %vm277_vm0, %v1070_v1, 0.0 }
 0x3e0   : > { %v1080_v4 = vadd.f32 %v1079_v3, %v1078_v62 }
 0x3e2   : > { %v1082_v5 = vadd.f32 %v1081_v2, %v1080_v4 }
 0x3e4   : > { %v1955_v6 = vadd.f32 %v1082_v5, %v1772_v0  ;;  %v1543_v0 = vld [vmem:[%s2028_s5] sm:$0xff] }
 0x3e5   : > { %1141 = vmatpush.bf16.msra.mxu0 %v1543_v0 }
 0x3e6   : > { %v1072_v7 = vpop.f32.mrf.mxu3  ;;  %v1084_v9 = vsel %vm277_vm0, %v1955_v6, 0.0 }
 0x3e7   : > { %1085 = vadd.xlane.f32.xlu1 %v1084_v9 }
 0x45a   : > { %v1086_v10 = vpop.xlane.xlu1 %1085 }
 0x45b   : > { %v1087_v11 = vmul.f32 %v1086_v10, %v1776_v8 }
 0x45d   : > { %v1088_v12 = vsub.f32 %v1955_v6, %v1087_v11 }
 0x45f   : > { %v1089_v13 = vmul.f32 %v1088_v12, %v1088_v12 }
 0x461   : > { %v1090_v14 = vsel %vm277_vm0, %v1089_v13, 0.0 }
 0x462   : > { %1091 = vadd.xlane.f32.xlu2 %v1090_v14 }
 0x4d5   : > { %v1092_v16 = vpop.xlane.xlu2 %1091 }
 0x4d6   : > { %v1093_v17 = vmul.f32 %v1092_v16, %v1776_v8 }
 0x4d8   : > { %v1094_v18 = vadd.f32 1e-05, %v1093_v17 }
 0x4da   : > { %1610 = vrsqrt.f32 %v1094_v18  ;;  %vm1101_vm9 = vweird.f32 %v1094_v18 }
 0x4e0   : > { %v1611_v19 = vpop.eup %1610 }
 0x4e1   : > { %v1096_v20 = vmul.f32 %v1611_v19, %v1094_v18  ;;  %vm1102_vm8 = vweird.f32 %v1611_v19 }
 0x4e2   : > { %vm1103_vm10 = vmor %vm1101_vm9, %vm1102_vm8 }
 0x4e3   : > { %v1097_v21 = vmul.f32 %v1611_v19, %v1096_v20 }
 0x4e5   : > { %v1098_v22 = vmul.f32 0.5, %v1097_v21 }
 0x4e7   : > { %v1099_v23 = vsub.f32 1.5, %v1098_v22 }
 0x4e9   : > { %v1100_v24 = vmul.f32 %v1611_v19, %v1099_v23 }
 0x4eb   : > { %v1104_v26 = vsel %vm1103_vm10, %v1611_v19, %v1100_v24 }
 0x4ec   : > { %v1105_v27 = vmul.f32 %v1104_v26, %v1088_v12 }
 0x4ee   : > { %v1107_v29 = vmul.f32 %v1106_v25, %v1105_v27 }
 0x4f0   : > { %v1109_v30 = vadd.f32 %v1108_v28, %v1107_v29 }
 0x4f2   : > { %v1110_v8 = vpack.c.bf16 %v1109_v30, %v1109_v30 }
 0x4f4   : > { %1481 = vmatmul.msk.bf16.vlgmr.msra.gmra.mxu0 %vm277_vm0, %v1110_v8 }
 0x571   : > { %v1143_v36 = vpop.f32.mrf.mxu0 }
 0x572   : > { %v1144_v38 = vadd.f32 %v1589_v35, %v1143_v36 }
 0x574   : > { %v1148_v39 = vmul.f32 %v1144_v38, %v1144_v38  ;;  %v1147_v46 = vmul.f32 0.5, %v1144_v38 }
 0x576   : > { %v1149_v40 = vmul.f32 %v1148_v39, %v1144_v38 }
 0x578   : > { %v1150_v41 = vmul.f32 0.044715, %v1149_v40 }
 0x579   : > { %v1145_v42 = vpop.f32.mrf.mxu0 }
 0x57a   : > { %v1151_v43 = vadd.f32 %v1150_v41, %v1144_v38 }
 0x57c   : > { %v1152_v44 = vmul.f32 0.7978846, %v1151_v43 }
 0x57e   : > { %1612 = vtanh.f32 %v1152_v44 }
 0x584   : > { %v1613_v45 = vpop.eup %1612 }
 0x585   : > { %v1154_v47 = vadd.f32 1.0, %v1613_v45 }
 0x587   : > { %v1155_v48 = vmul.f32 %v1154_v47, %v1147_v46 }
 0x589   : > { %v1156_v49 = vpack.c.bf16 %v1155_v48, %v1155_v48 }
 0x58b   : > { %1498 = vmatmul.msk.bf16.vlgmr.msra.gmra.mxu1 %vm675_vm5, %v1156_v49 }
 0x608   : > { %v1202_v51 = vpop.f32.mrf.mxu1 }
 0x609   : > { %v1203_v52 = vadd.f32 %v1202_v51, %v1165_v50 }
 0x60b   : > { %v1206_v53 = vadd.f32 %v1203_v52, %v1955_v6 }
 0x60d   : > { %1207 = vst.msk [vmem:[%s269_s22] sm:$0xff] %vm277_vm0, %v1206_v53 }
 0x60e   : > { %1641 = shalt.err (!%p1638_p3)
}
 0x60f   : > { %1549 = dma.vmem_to_hbm [thread:$0]  (%p1757_p5), %s1222_s23, 128, %s1224_s29, %s1209_s8  }
 0x610   : > { %v1204_v37 = vpop.f32.mrf.mxu1 }
 0x611 PF: > { %p1555_p4 = scmp.ge.s32.totalorder %s1676_s27, 2  ;;  %s1235_s16 = sand.u32 1, %s1664_s24  }
 0x612   : > { %s1236_s19 = scalar_lea.sflag [#allocation3], %s1235_s16 }
 0x613   : > { %p1552_p7 = pnand %p1555_p4, %p1761_p6 }
 0x615   : > { %p1553_p8 = pneg %p1552_p7 }
 0x617   : > { %1659 = dma.done.wait (%p1553_p8), %s1236_s19, 128  }
 0x618   : > { %1661 = vsyncadd (%p1553_p8), %s1236_s19, 4294967168  ;;  %p17_p9 = scmp.ge.s32.totalorder %s1744_s30, 4   ;;  %s2033_s24 = smov %s1668_s25 }
 0x619   : > { %s2034_s25 = smov %s1672_s26  ;;  %s2035_s26 = smov %s1755_s10 }
 0x61a   : > { %s2036_s27 = smov %s1744_s30  ;;  %19 = sbr.rel (!%p17_p9) target bundleno = 3 (0x3), region = 83 }
 0x61f   :  { %1242 = vsyncpa [#allocation3], 1 }
 0x620   :  { %1244 = vsyncpa [#allocation3 + $0x1], 1 }

</bundles_post_ra>
